<compile_context>
chip_gen: v7x
topology: tpu7x:2x2x1
jax: 0.10.0
libtpu: 0.0.40
codegen_flags: <defaults>
</compile_context>

<pallas_src>
import jax
import jax.numpy as jnp
from jax import lax
from jax.experimental import pallas as pl
from jax.experimental.pallas import tpu as pltpu

# ---------------- model dims (small, synthetic) ----------------
B, L, D, H, NL, DOUT = 2, 8, 32, 4, 2, 16
DH = D // H
DOUT_PAD = 128       # lane-dense output tile; real columns sliced outside
EPS = 1e-5           # nn.LayerNorm default
NEG_INF = -1e30      # causal mask additive bias


def _layernorm(x, g, b):
    mu = jnp.mean(x, axis=-1, keepdims=True)
    var = jnp.mean((x - mu) ** 2, axis=-1, keepdims=True)
    return (x - mu) * lax.rsqrt(var + EPS) * g + b


def text_encoder_kernel(eot_ref,                       # scalar-prefetch (SMEM)
                        prompts_ref, pos_ref,
                        ln1_g_ref, ln1_b_ref,
                        w_in_ref, b_in_ref, w_out_ref, b_out_ref,
                        ln2_g_ref, ln2_b_ref,
                        w_fc_ref, b_fc_ref, w_pr_ref, b_pr_ref,
                        lnf_g_ref, lnf_b_ref, tproj_ref,
                        out_ref,
                        x_scratch, attn_scratch, mask_scratch):
    layer = pl.program_id(0)

    # ---- one-time init: embedding + positional add (one unmasked store), mask ----
    @pl.when(layer == 0)
    def _init():
        x_scratch[...] = prompts_ref[...] + pos_ref[...]            # (B*L, D)
        row = lax.broadcasted_iota(jnp.int32, (L, L), 0)
        col = lax.broadcasted_iota(jnp.int32, (L, L), 1)
        mask_scratch[...] = jnp.where(col > row, NEG_INF, 0.0).astype(jnp.float32)

    x = x_scratch[...]                      # (B*L, D) f32, carried across layers
    causal = mask_scratch[...]              # (L, L)

    # ---------------- attention block (pre-LN, causal MHA) ----------------
    h = _layernorm(x, ln1_g_ref[0], ln1_b_ref[0])                       # f32
    qkv = jnp.dot(h.astype(jnp.bfloat16), w_in_ref[0],
                  preferred_element_type=jnp.float32) + b_in_ref[0]     # (B*L, 3D)
    # 1/sqrt(DH) is already folded into the Q columns of w_in/b_in.
    q = qkv[:, 0 * D:1 * D].astype(jnp.bfloat16)                        # (B*L, D)
    k_t = qkv[:, 1 * D:2 * D].T.astype(jnp.bfloat16)                    # (D, B*L): ONE transpose/layer
    v = qkv[:, 2 * D:3 * D].astype(jnp.bfloat16)                        # (B*L, D)

    # TODO(synk): at real CLIP batch sizes move batch onto a 'parallel' grid
    # axis (or a lax.fori_loop over VMEM views) instead of Python-unrolling
    # B*H blocks; only the short fixed H loop should stay unrolled.
    for b in range(B):
        rs = slice(b * L, (b + 1) * L)
        for hh in range(H):
            cs = slice(hh * DH, (hh + 1) * DH)
            # bf16 x bf16 MXU matmuls, f32 accumulation.
            s = jnp.dot(q[rs, cs], k_t[cs, rs],
                        preferred_element_type=jnp.float32) + causal    # (L, L) f32
            s = s - jnp.max(s, axis=-1, keepdims=True)
            p = jnp.exp(s)
            p = p * pl.reciprocal(jnp.sum(p, axis=-1, keepdims=True),
                                  approx=True)
            # Direct in-place write of this head's output (no concats).
            attn_scratch[rs, cs] = jnp.dot(p.astype(jnp.bfloat16), v[rs, cs],
                                           preferred_element_type=jnp.float32)

    attn = jnp.dot(attn_scratch[...].astype(jnp.bfloat16), w_out_ref[0],
                   preferred_element_type=jnp.float32) + b_out_ref[0]   # (B*L, D)
    x = x + attn

    # ---------------- MLP block (QuickGELU) ----------------
    # QuickGELU kept in f32 (v5e has no bf16 VPU/EUP path); could be bf16 on v6e/v7x.
    h2 = _layernorm(x, ln2_g_ref[0], ln2_b_ref[0])
    f = jnp.dot(h2.astype(jnp.bfloat16), w_fc_ref[0],
                preferred_element_type=jnp.float32) + b_fc_ref[0]       # (B*L, 4D)
    f = f * (1.0 / (1.0 + jnp.exp(-1.702 * f)))                         # QuickGELU
    m = jnp.dot(f.astype(jnp.bfloat16), w_pr_ref[0],
                preferred_element_type=jnp.float32) + b_pr_ref[0]
    x = x + m
    x_scratch[...] = x

    # ---------------- epilogue on last layer ----------------
    @pl.when(layer == NL - 1)
    def _final():
        # EOT gather with scalar-prefetched indices (rows are b*L + eot[b]).
        # TODO(synk): at serving batch sizes fold pooling/ln_final/projection
        # into a per-batch-block grid axis instead of B serialized row slices.
        rows = [x_scratch[pl.ds(b * L + eot_ref[b], 1), :] for b in range(B)]
        pooled = jnp.concatenate(rows, axis=0)                          # (B, D)
        pooled = _layernorm(pooled, lnf_g_ref[...], lnf_b_ref[...])
        # Lane-dense (B, DOUT_PAD) store; real DOUT columns sliced outside.
        out_ref[...] = jnp.dot(pooled.astype(jnp.bfloat16), tproj_ref[...],
                               preferred_element_type=jnp.float32)


def text_encoder(prompts, pos, eot_idx, kparams):
    (ln1_g, ln1_b, w_in, b_in, w_out, b_out, ln2_g, ln2_b,
     w_fc, b_fc, w_pr, b_pr, lnf_g, lnf_b, tproj_pad) = kparams

    prompts_flat = prompts.reshape(B * L, D)          # layout plumbing only
    pos_bcast = jnp.tile(pos, (B, 1))                 # (B*L, D): single-store init

    def per_layer(a):                                 # streamed: one layer per step
        nd = a.ndim
        return pl.BlockSpec((1,) + a.shape[1:], lambda l, e: (l,) + (0,) * (nd - 1))

    def const(a):                                     # resident across the grid
        nd = a.ndim
        return pl.BlockSpec(a.shape, lambda l, e: (0,) * nd)

    in_specs = [
        const(prompts_flat),                          # (B*L, D)
        const(pos_bcast),                             # (B*L, D)
        per_layer(ln1_g), per_layer(ln1_b),
        per_layer(w_in), per_layer(b_in),
        per_layer(w_out), per_layer(b_out),
        per_layer(ln2_g), per_layer(ln2_b),
        per_layer(w_fc), per_layer(b_fc),
        per_layer(w_pr), per_layer(b_pr),
        const(lnf_g), const(lnf_b), const(tproj_pad),
    ]

    # NOTE: on v7x (2 TensorCores) and at real CLIP batch sizes, add a leading
    # "parallel" batch-block grid axis (per-block prompts/out specs + per-block
    # x_scratch) so both cores get work — only when compute-bound; at small B
    # both cores would just stream identical weights and double HBM traffic.
    out_pad = pl.pallas_call(
        text_encoder_kernel,
        out_shape=jax.ShapeDtypeStruct((B, DOUT_PAD), jnp.float32),
        grid_spec=pltpu.PrefetchScalarGridSpec(
            num_scalar_prefetch=1,
            grid=(NL,),
            in_specs=in_specs,
            out_specs=pl.BlockSpec((B, DOUT_PAD), lambda l, e: (0, 0)),
            scratch_shapes=[pltpu.VMEM((B * L, D), jnp.float32),   # activations
                            pltpu.VMEM((B * L, D), jnp.float32),   # per-head attn out
                            pltpu.VMEM((L, L), jnp.float32)],      # causal mask
        ),
        compiler_params=pltpu.CompilerParams(
            dimension_semantics=("arbitrary",),        # layer axis carries state
            vmem_limit_bytes=32 * 1024 * 1024),
    )(eot_idx.astype(jnp.int32), prompts_flat, pos_bcast,
      ln1_g, ln1_b, w_in, b_in, w_out, b_out, ln2_g, ln2_b,
      w_fc, b_fc, w_pr, b_pr, lnf_g, lnf_b, tproj_pad)
    return out_pad[:, :DOUT]


# ---------------- deterministic synthetic parameters (PyTorch-equivalent) ----------------
def init_params(key):
    ks = jax.random.split(key, 11)
    bf16 = jnp.bfloat16

    def w(k, shape, scale=0.02, dtype=jnp.float32):
        return (jax.random.normal(k, shape, jnp.float32) * scale).astype(dtype)

    ln1_g = jnp.ones((NL, 1, D), jnp.float32)
    ln1_b = w(ks[0], (NL, 1, D), 0.01)
    w_in  = w(ks[1], (NL, D, 3 * D), 0.02, bf16)     # fused [Q|K|V] projection
    b_in  = w(ks[2], (NL, 1, 3 * D), 0.01)
    w_out = w(ks[3], (NL, D, D), 0.02, bf16)
    b_out = w(ks[4], (NL, 1, D), 0.01)
    ln2_g = jnp.ones((NL, 1, D), jnp.float32)
    ln2_b = w(ks[5], (NL, 1, D), 0.01)
    w_fc  = w(ks[6], (NL, D, 4 * D), 0.02, bf16)
    b_fc  = w(ks[7], (NL, 1, 4 * D), 0.01)
    w_pr  = w(ks[8], (NL, 4 * D, D), 0.02, bf16)
    b_pr  = w(ks[9], (NL, 1, D), 0.01)
    lnf_g = jnp.ones((1, D), jnp.float32)
    lnf_b = jnp.zeros((1, D), jnp.float32)
    tproj = w(ks[10], (D, DOUT), 0.02, bf16)
    return (ln1_g, ln1_b, w_in, b_in, w_out, b_out, ln2_g, ln2_b,
            w_fc, b_fc, w_pr, b_pr, lnf_g, lnf_b, tproj)


# --------- one-time weight conversion for the kernel (scale fold + lane pad) ---------
def prepare_kernel_params(params):
    (ln1_g, ln1_b, w_in, b_in, w_out, b_out, ln2_g, ln2_b,
     w_fc, b_fc, w_pr, b_pr, lnf_g, lnf_b, tproj) = params
    scale = 1.0 / (DH ** 0.5)
    # Fold 1/sqrt(DH) into the Q column block of the fused QKV weight/bias.
    w_in_q = (w_in[:, :, :D].astype(jnp.float32) * scale).astype(w_in.dtype)
    w_in_f = jnp.concatenate([w_in_q, w_in[:, :, D:]], axis=-1)
    b_in_f = jnp.concatenate([b_in[:, :, :D] * scale, b_in[:, :, D:]], axis=-1)
    # Pad text_projection columns to a multiple of 128 for an unmasked store.
    tproj_pad = jnp.zeros((D, DOUT_PAD), tproj.dtype).at[:, :DOUT].set(tproj)
    return (ln1_g, ln1_b, w_in_f, b_in_f, w_out, b_out, ln2_g, ln2_b,
            w_fc, b_fc, w_pr, b_pr, lnf_g, lnf_b, tproj_pad)


# ---------------- pure-JAX reference (mirrors the PyTorch math) ----------------
def reference_forward(prompts, pos, eot_idx, params):
    (ln1_g, ln1_b, w_in, b_in, w_out, b_out, ln2_g, ln2_b,
     w_fc, b_fc, w_pr, b_pr, lnf_g, lnf_b, tproj) = params

    def ln(x, g, b):
        mu = x.mean(-1, keepdims=True)
        var = ((x - mu) ** 2).mean(-1, keepdims=True)
        return (x - mu) / jnp.sqrt(var + EPS) * g + b

    def f32(a):
        return a.astype(jnp.float32)

    x = prompts + pos[None]                                     # (B, L, D)
    rowi = jnp.arange(L)[:, None]
    coli = jnp.arange(L)[None, :]
    bias = jnp.where(coli > rowi, NEG_INF, 0.0)
    scale = 1.0 / (DH ** 0.5)

    def split_heads(t):
        return t.reshape(B, L, H, DH).transpose(0, 2, 1, 3)     # (B, H, L, DH)

    for layer in range(NL):
        h = ln(x, ln1_g[layer], ln1_b[layer])
        qkv = h @ f32(w_in[layer]) + b_in[layer]                # (B, L, 3D)
        q, k, v = qkv[..., :D], qkv[..., D:2 * D], qkv[..., 2 * D:]
        qh, kh, vh = split_heads(q) * scale, split_heads(k), split_heads(v)
        s = jnp.einsum('bhqd,bhkd->bhqk', qh, kh) + bias
        p = jax.nn.softmax(s, axis=-1)
        o = jnp.einsum('bhqk,bhkd->bhqd', p, vh)
        o = o.transpose(0, 2, 1, 3).reshape(B, L, D)
        x = x + o @ f32(w_out[layer]) + b_out[layer]
        h2 = ln(x, ln2_g[layer], ln2_b[layer])
        f = h2 @ f32(w_fc[layer]) + b_fc[layer]
        f = f * jax.nn.sigmoid(1.702 * f)                       # QuickGELU
        x = x + f @ f32(w_pr[layer]) + b_pr[layer]
    xf = ln(x, lnf_g, lnf_b)
    pooled = xf[jnp.arange(B), eot_idx]                         # (B, D)
    return pooled @ f32(tproj)


if __name__ == "__main__":
    key = jax.random.PRNGKey(0)
    k_prompts, k_pos, k_tok, k_par = jax.random.split(key, 4)

    prompts = jax.random.normal(k_prompts, (B, L, D), jnp.float32) * 0.1
    pos = jax.random.normal(k_pos, (L, D), jnp.float32) * 0.01

    # tokenized_prompts: argmax(-1) picks the EOT position (largest token id)
    tokens = jax.random.randint(k_tok, (B, L), 1, 100, dtype=jnp.int32)
    tokens = tokens.at[0, 5].set(49407).at[1, 7].set(49407)
    eot_idx = jnp.argmax(tokens, axis=-1).astype(jnp.int32)

    params = init_params(k_par)
    kparams = prepare_kernel_params(params)   # one-time static weight transform

    out = text_encoder(prompts, pos, eot_idx, kparams)
    out = jax.block_until_ready(out)

    ref = reference_forward(prompts, pos, eot_idx, params)
    assert out.shape == (B, DOUT), out.shape
    max_err = float(jnp.max(jnp.abs(out - ref)))
    # Kernel runs matmul inputs (incl. attention q/k/p/v) in bf16 with f32
    # accumulation and uses an approximate EUP reciprocal in softmax; the
    # reference keeps activations in f32 with exact softmax.
    assert max_err < 1e-2, f"kernel/reference mismatch, max abs err {max_err}"

    print("KERNEL_OK")
</pallas_src>

<mosaic_0001>
module attributes {stable_mosaic.version = 11 : i64} {
  func.func @text_encoder_kernel(%arg0: i32, %arg1: memref<2xi32, #tpu.memory_space<smem>>, %arg2: memref<16x32xf32, #tpu.memory_space<vmem>>, %arg3: memref<16x32xf32, #tpu.memory_space<vmem>>, %arg4: memref<1x1x32xf32, #tpu.memory_space<vmem>>, %arg5: memref<1x1x32xf32, #tpu.memory_space<vmem>>, %arg6: memref<1x32x96xbf16, #tpu.memory_space<vmem>>, %arg7: memref<1x1x96xf32, #tpu.memory_space<vmem>>, %arg8: memref<1x32x32xbf16, #tpu.memory_space<vmem>>, %arg9: memref<1x1x32xf32, #tpu.memory_space<vmem>>, %arg10: memref<1x1x32xf32, #tpu.memory_space<vmem>>, %arg11: memref<1x1x32xf32, #tpu.memory_space<vmem>>, %arg12: memref<1x32x128xbf16, #tpu.memory_space<vmem>>, %arg13: memref<1x1x128xf32, #tpu.memory_space<vmem>>, %arg14: memref<1x128x32xbf16, #tpu.memory_space<vmem>>, %arg15: memref<1x1x32xf32, #tpu.memory_space<vmem>>, %arg16: memref<1x32xf32, #tpu.memory_space<vmem>>, %arg17: memref<1x32xf32, #tpu.memory_space<vmem>>, %arg18: memref<32x128xbf16, #tpu.memory_space<vmem>>, %arg19: memref<2x128xf32, #tpu.memory_space<vmem>>, %arg20: memref<16x32xf32, #tpu.memory_space<vmem>>, %arg21: memref<16x32xf32, #tpu.memory_space<vmem>>, %arg22: memref<8x8xf32, #tpu.memory_space<vmem>>) attributes {dimension_semantics = [#tpu.dimension_semantics<arbitrary>], iteration_bounds = array<i64: 2>, scalar_prefetch = 1 : i64, scratch_operands = 3 : i64, tpu.core_type = #tpu.core_type<tc>, window_params = [{pipeline_mode = #tpu.pipeline_mode<synchronous>, transform_indices = @transform_0, window_bounds = array<i64: 16, 32>}, {pipeline_mode = #tpu.pipeline_mode<synchronous>, transform_indices = @transform_1, window_bounds = array<i64: 16, 32>}, {transform_indices = @transform_2, window_bounds = array<i64: 1, 1, 32>}, {transform_indices = @transform_3, window_bounds = array<i64: 1, 1, 32>}, {transform_indices = @transform_4, window_bounds = array<i64: 1, 32, 96>}, {transform_indices = @transform_5, window_bounds = array<i64: 1, 1, 96>}, {transform_indices = @transform_6, window_bounds = array<i64: 1, 32, 32>}, {transform_indices = @transform_7, window_bounds = array<i64: 1, 1, 32>}, {transform_indices = @transform_8, window_bounds = array<i64: 1, 1, 32>}, {transform_indices = @transform_9, window_bounds = array<i64: 1, 1, 32>}, {transform_indices = @transform_10, window_bounds = array<i64: 1, 32, 128>}, {transform_indices = @transform_11, window_bounds = array<i64: 1, 1, 128>}, {transform_indices = @transform_12, window_bounds = array<i64: 1, 128, 32>}, {transform_indices = @transform_13, window_bounds = array<i64: 1, 1, 32>}, {pipeline_mode = #tpu.pipeline_mode<synchronous>, transform_indices = @transform_14, window_bounds = array<i64: 1, 32>}, {pipeline_mode = #tpu.pipeline_mode<synchronous>, transform_indices = @transform_15, window_bounds = array<i64: 1, 32>}, {pipeline_mode = #tpu.pipeline_mode<synchronous>, transform_indices = @transform_16, window_bounds = array<i64: 32, 128>}, {pipeline_mode = #tpu.pipeline_mode<synchronous>, transform_indices = @transform_17, window_bounds = array<i64: 2, 128>}]} {
    %c0_i32 = arith.constant 0 : i32
    %0 = arith.cmpi eq, %arg0, %c0_i32 : i32
    %1 = arith.extui %0 : i1 to i32
    %c0_i32_0 = arith.constant 0 : i32
    %2 = arith.cmpi ne, %1, %c0_i32_0 : i32
    scf.if %2 {
      %c0_106 = arith.constant 0 : index
      %c0_107 = arith.constant 0 : index
      %255 = vector.load %arg2[%c0_106, %c0_107] : memref<16x32xf32, #tpu.memory_space<vmem>>, vector<16x32xf32>
      %c0_108 = arith.constant 0 : index
      %c0_109 = arith.constant 0 : index
      %256 = vector.load %arg3[%c0_108, %c0_109] : memref<16x32xf32, #tpu.memory_space<vmem>>, vector<16x32xf32>
      %257 = arith.addf %255, %256 : vector<16x32xf32>
      %c0_110 = arith.constant 0 : index
      %c0_111 = arith.constant 0 : index
      %258 = vector.load %arg20[%c0_110, %c0_111] : memref<16x32xf32, #tpu.memory_space<vmem>>, vector<16x32xf32>
      tpu.vector_store %arg20[%c0_110, %c0_111], %257 {strides = array<i32>} : memref<16x32xf32, #tpu.memory_space<vmem>>, vector<16x32xf32>,
      %259 = tpu.iota {dimensions = array<i32: 0>} : vector<8x8xi32>
      %260 = tpu.iota {dimensions = array<i32: 1>} : vector<8x8xi32>
      %261 = arith.cmpi sgt, %260, %259 : vector<8x8xi32>
      %cst_112 = arith.constant -1.000000e+30 : f32
      %cst_113 = arith.constant 0.000000e+00 : f32
      %262 = vector.broadcast %cst_112 : f32 to vector<8x8xf32>
      %263 = vector.broadcast %cst_113 : f32 to vector<8x8xf32>
      %264 = arith.select %261, %262, %263 : vector<8x8xi1>, vector<8x8xf32>
      %c0_114 = arith.constant 0 : index
      %c0_115 = arith.constant 0 : index
      %265 = vector.load %arg22[%c0_114, %c0_115] : memref<8x8xf32, #tpu.memory_space<vmem>>, vector<8x8xf32>
      tpu.vector_store %arg22[%c0_114, %c0_115], %264 {strides = array<i32>} : memref<8x8xf32, #tpu.memory_space<vmem>>, vector<8x8xf32>,
    } else {
    }
    %c0 = arith.constant 0 : index
    %c0_1 = arith.constant 0 : index
    %3 = vector.load %arg20[%c0, %c0_1] : memref<16x32xf32, #tpu.memory_space<vmem>>, vector<16x32xf32>
    %c0_2 = arith.constant 0 : index
    %c0_3 = arith.constant 0 : index
    %4 = vector.load %arg22[%c0_2, %c0_3] : memref<8x8xf32, #tpu.memory_space<vmem>>, vector<8x8xf32>
    %c0_4 = arith.constant 0 : index
    %c0_5 = arith.constant 0 : index
    %c0_6 = arith.constant 0 : index
    %5 = vector.load %arg4[%c0_4, %c0_5, %c0_6] : memref<1x1x32xf32, #tpu.memory_space<vmem>>, vector<1x1x32xf32>
    %6 = vector.shape_cast %5 : vector<1x1x32xf32> to vector<1x32xf32>
    %c0_7 = arith.constant 0 : index
    %c0_8 = arith.constant 0 : index
    %c0_9 = arith.constant 0 : index
    %7 = vector.load %arg5[%c0_7, %c0_8, %c0_9] : memref<1x1x32xf32, #tpu.memory_space<vmem>>, vector<1x1x32xf32>
    %8 = vector.shape_cast %7 : vector<1x1x32xf32> to vector<1x32xf32>
    %cst = arith.constant dense<0.000000e+00> : vector<16xf32>
    %9 = vector.multi_reduction <add>, %3, %cst [1] : vector<16x32xf32> to vector<16xf32>
    %10 = vector.shape_cast %9 : vector<16xf32> to vector<16x1xf32>
    %cst_10 = arith.constant 3.200000e+01 : f32
    %11 = vector.broadcast %cst_10 : f32 to vector<16x1xf32>
    %12 = arith.divf %10, %11 : vector<16x1xf32>
    %13 = vector.broadcast %12 : vector<16x1xf32> to vector<16x32xf32>
    %14 = arith.subf %3, %13 : vector<16x32xf32>
    %15 = arith.mulf %14, %14 : vector<16x32xf32>
    %cst_11 = arith.constant dense<0.000000e+00> : vector<16xf32>
    %16 = vector.multi_reduction <add>, %15, %cst_11 [1] : vector<16x32xf32> to vector<16xf32>
    %17 = vector.shape_cast %16 : vector<16xf32> to vector<16x1xf32>
    %cst_12 = arith.constant 3.200000e+01 : f32
    %18 = vector.broadcast %cst_12 : f32 to vector<16x1xf32>
    %19 = arith.divf %17, %18 : vector<16x1xf32>
    %20 = vector.broadcast %12 : vector<16x1xf32> to vector<16x32xf32>
    %21 = arith.subf %3, %20 : vector<16x32xf32>
    %cst_13 = arith.constant 9.99999974E-6 : f32
    %22 = vector.broadcast %cst_13 : f32 to vector<16x1xf32>
    %23 = arith.addf %19, %22 : vector<16x1xf32>
    %24 = math.rsqrt %23 : vector<16x1xf32>
    %25 = vector.broadcast %24 : vector<16x1xf32> to vector<16x32xf32>
    %26 = arith.mulf %21, %25 : vector<16x32xf32>
    %27 = vector.broadcast %6 : vector<1x32xf32> to vector<16x32xf32>
    %28 = arith.mulf %26, %27 : vector<16x32xf32>
    %29 = vector.broadcast %8 : vector<1x32xf32> to vector<16x32xf32>
    %30 = arith.addf %28, %29 : vector<16x32xf32>
    %31 = arith.truncf %30 : vector<16x32xf32> to vector<16x32xbf16>
    %c0_14 = arith.constant 0 : index
    %c0_15 = arith.constant 0 : index
    %c0_16 = arith.constant 0 : index
    %32 = vector.load %arg6[%c0_14, %c0_15, %c0_16] : memref<1x32x96xbf16, #tpu.memory_space<vmem>>, vector<1x32x96xbf16>
    %33 = vector.shape_cast %32 : vector<1x32x96xbf16> to vector<32x96xbf16>
    %cst_17 = arith.constant dense<0.000000e+00> : vector<16x96xf32>
    %34 = tpu.matmul %31, %33, %cst_17 {dimension_numbers = #tpu.dot_dimension_numbers<[1], [0], [0], [1], [0, 0, 1, 1], [], []>} : vector<16x32xbf16>, vector<32x96xbf16>, vector<16x96xf32> -> vector<16x96xf32>
    %c0_18 = arith.constant 0 : index
    %c0_19 = arith.constant 0 : index
    %c0_20 = arith.constant 0 : index
    %35 = vector.load %arg7[%c0_18, %c0_19, %c0_20] : memref<1x1x96xf32, #tpu.memory_space<vmem>>, vector<1x1x96xf32>
    %36 = vector.shape_cast %35 : vector<1x1x96xf32> to vector<1x96xf32>
    %37 = vector.broadcast %36 : vector<1x96xf32> to vector<16x96xf32>
    %38 = arith.addf %34, %37 : vector<16x96xf32>
    %39 = vector.extract_strided_slice %38 {offsets = [0, 0], sizes = [16, 32], strides = [1, 1]} : vector<16x96xf32> to vector<16x32xf32>
    %40 = arith.truncf %39 : vector<16x32xf32> to vector<16x32xbf16>
    %41 = vector.extract_strided_slice %38 {offsets = [0, 32], sizes = [16, 32], strides = [1, 1]} : vector<16x96xf32> to vector<16x32xf32>
    %42 = tpu.transpose %41, [1, 0] : vector<16x32xf32> -> vector<32x16xf32>
    %43 = arith.truncf %42 : vector<32x16xf32> to vector<32x16xbf16>
    %44 = vector.extract_strided_slice %38 {offsets = [0, 64], sizes = [16, 32], strides = [1, 1]} : vector<16x96xf32> to vector<16x32xf32>
    %45 = arith.truncf %44 : vector<16x32xf32> to vector<16x32xbf16>
    %46 = vector.extract_strided_slice %40 {offsets = [0, 0], sizes = [8, 8], strides = [1, 1]} : vector<16x32xbf16> to vector<8x8xbf16>
    %47 = vector.extract_strided_slice %43 {offsets = [0, 0], sizes = [8, 8], strides = [1, 1]} : vector<32x16xbf16> to vector<8x8xbf16>
    %cst_21 = arith.constant dense<0.000000e+00> : vector<8x8xf32>
    %48 = tpu.matmul %46, %47, %cst_21 {dimension_numbers = #tpu.dot_dimension_numbers<[1], [0], [0], [1], [0, 0, 1, 1], [], []>} : vector<8x8xbf16>, vector<8x8xbf16>, vector<8x8xf32> -> vector<8x8xf32>
    %49 = arith.addf %48, %4 : vector<8x8xf32>
    %cst_22 = arith.constant dense<0xFF800000> : vector<8xf32>
    %50 = vector.multi_reduction <maximumf>, %49, %cst_22 [1] : vector<8x8xf32> to vector<8xf32>
    %51 = vector.shape_cast %50 : vector<8xf32> to vector<8x1xf32>
    %52 = vector.broadcast %51 : vector<8x1xf32> to vector<8x8xf32>
    %53 = arith.subf %49, %52 : vector<8x8xf32>
    %54 = math.exp %53 : vector<8x8xf32>
    %cst_23 = arith.constant dense<0.000000e+00> : vector<8xf32>
    %55 = vector.multi_reduction <add>, %54, %cst_23 [1] : vector<8x8xf32> to vector<8xf32>
    %56 = vector.shape_cast %55 : vector<8xf32> to vector<8x1xf32>
    %57 = tpu.reciprocal %56 {approx = true} : vector<8x1xf32> -> vector<8x1xf32>
    %58 = vector.broadcast %57 : vector<8x1xf32> to vector<8x8xf32>
    %59 = arith.mulf %54, %58 : vector<8x8xf32>
    %60 = arith.truncf %59 : vector<8x8xf32> to vector<8x8xbf16>
    %61 = vector.extract_strided_slice %45 {offsets = [0, 0], sizes = [8, 8], strides = [1, 1]} : vector<16x32xbf16> to vector<8x8xbf16>
    %cst_24 = arith.constant dense<0.000000e+00> : vector<8x8xf32>
    %62 = tpu.matmul %60, %61, %cst_24 {dimension_numbers = #tpu.dot_dimension_numbers<[1], [0], [0], [1], [0, 0, 1, 1], [], []>} : vector<8x8xbf16>, vector<8x8xbf16>, vector<8x8xf32> -> vector<8x8xf32>
    %c0_25 = arith.constant 0 : index
    %c0_26 = arith.constant 0 : index
    %63 = vector.load %arg21[%c0_25, %c0_26] : memref<16x32xf32, #tpu.memory_space<vmem>>, vector<8x8xf32>
    tpu.vector_store %arg21[%c0_25, %c0_26], %62 {strides = array<i32>} : memref<16x32xf32, #tpu.memory_space<vmem>>, vector<8x8xf32>,
    %64 = vector.extract_strided_slice %40 {offsets = [0, 8], sizes = [8, 8], strides = [1, 1]} : vector<16x32xbf16> to vector<8x8xbf16>
    %65 = vector.extract_strided_slice %43 {offsets = [8, 0], sizes = [8, 8], strides = [1, 1]} : vector<32x16xbf16> to vector<8x8xbf16>
    %cst_27 = arith.constant dense<0.000000e+00> : vector<8x8xf32>
    %66 = tpu.matmul %64, %65, %cst_27 {dimension_numbers = #tpu.dot_dimension_numbers<[1], [0], [0], [1], [0, 0, 1, 1], [], []>} : vector<8x8xbf16>, vector<8x8xbf16>, vector<8x8xf32> -> vector<8x8xf32>
    %67 = arith.addf %66, %4 : vector<8x8xf32>
    %cst_28 = arith.constant dense<0xFF800000> : vector<8xf32>
    %68 = vector.multi_reduction <maximumf>, %67, %cst_28 [1] : vector<8x8xf32> to vector<8xf32>
    %69 = vector.shape_cast %68 : vector<8xf32> to vector<8x1xf32>
    %70 = vector.broadcast %69 : vector<8x1xf32> to vector<8x8xf32>
    %71 = arith.subf %67, %70 : vector<8x8xf32>
    %72 = math.exp %71 : vector<8x8xf32>
    %cst_29 = arith.constant dense<0.000000e+00> : vector<8xf32>
    %73 = vector.multi_reduction <add>, %72, %cst_29 [1] : vector<8x8xf32> to vector<8xf32>
    %74 = vector.shape_cast %73 : vector<8xf32> to vector<8x1xf32>
    %75 = tpu.reciprocal %74 {approx = true} : vector<8x1xf32> -> vector<8x1xf32>
    %76 = vector.broadcast %75 : vector<8x1xf32> to vector<8x8xf32>
    %77 = arith.mulf %72, %76 : vector<8x8xf32>
    %78 = arith.truncf %77 : vector<8x8xf32> to vector<8x8xbf16>
    %79 = vector.extract_strided_slice %45 {offsets = [0, 8], sizes = [8, 8], strides = [1, 1]} : vector<16x32xbf16> to vector<8x8xbf16>
    %cst_30 = arith.constant dense<0.000000e+00> : vector<8x8xf32>
    %80 = tpu.matmul %78, %79, %cst_30 {dimension_numbers = #tpu.dot_dimension_numbers<[1], [0], [0], [1], [0, 0, 1, 1], [], []>} : vector<8x8xbf16>, vector<8x8xbf16>, vector<8x8xf32> -> vector<8x8xf32>
    %c0_31 = arith.constant 0 : index
    %c8 = arith.constant 8 : index
    %81 = vector.load %arg21[%c0_31, %c8] : memref<16x32xf32, #tpu.memory_space<vmem>>, vector<8x8xf32>
    tpu.vector_store %arg21[%c0_31, %c8], %80 {strides = array<i32>} : memref<16x32xf32, #tpu.memory_space<vmem>>, vector<8x8xf32>,
    %82 = vector.extract_strided_slice %40 {offsets = [0, 16], sizes = [8, 8], strides = [1, 1]} : vector<16x32xbf16> to vector<8x8xbf16>
    %83 = vector.extract_strided_slice %43 {offsets = [16, 0], sizes = [8, 8], strides = [1, 1]} : vector<32x16xbf16> to vector<8x8xbf16>
    %cst_32 = arith.constant dense<0.000000e+00> : vector<8x8xf32>
    %84 = tpu.matmul %82, %83, %cst_32 {dimension_numbers = #tpu.dot_dimension_numbers<[1], [0], [0], [1], [0, 0, 1, 1], [], []>} : vector<8x8xbf16>, vector<8x8xbf16>, vector<8x8xf32> -> vector<8x8xf32>
    %85 = arith.addf %84, %4 : vector<8x8xf32>
    %cst_33 = arith.constant dense<0xFF800000> : vector<8xf32>
    %86 = vector.multi_reduction <maximumf>, %85, %cst_33 [1] : vector<8x8xf32> to vector<8xf32>
    %87 = vector.shape_cast %86 : vector<8xf32> to vector<8x1xf32>
    %88 = vector.broadcast %87 : vector<8x1xf32> to vector<8x8xf32>
    %89 = arith.subf %85, %88 : vector<8x8xf32>
    %90 = math.exp %89 : vector<8x8xf32>
    %cst_34 = arith.constant dense<0.000000e+00> : vector<8xf32>
    %91 = vector.multi_reduction <add>, %90, %cst_34 [1] : vector<8x8xf32> to vector<8xf32>
    %92 = vector.shape_cast %91 : vector<8xf32> to vector<8x1xf32>
    %93 = tpu.reciprocal %92 {approx = true} : vector<8x1xf32> -> vector<8x1xf32>
    %94 = vector.broadcast %93 : vector<8x1xf32> to vector<8x8xf32>
    %95 = arith.mulf %90, %94 : vector<8x8xf32>
    %96 = arith.truncf %95 : vector<8x8xf32> to vector<8x8xbf16>
    %97 = vector.extract_strided_slice %45 {offsets = [0, 16], sizes = [8, 8], strides = [1, 1]} : vector<16x32xbf16> to vector<8x8xbf16>
    %cst_35 = arith.constant dense<0.000000e+00> : vector<8x8xf32>
    %98 = tpu.matmul %96, %97, %cst_35 {dimension_numbers = #tpu.dot_dimension_numbers<[1], [0], [0], [1], [0, 0, 1, 1], [], []>} : vector<8x8xbf16>, vector<8x8xbf16>, vector<8x8xf32> -> vector<8x8xf32>
    %c0_36 = arith.constant 0 : index
    %c16 = arith.constant 16 : index
    %99 = vector.load %arg21[%c0_36, %c16] : memref<16x32xf32, #tpu.memory_space<vmem>>, vector<8x8xf32>
    tpu.vector_store %arg21[%c0_36, %c16], %98 {strides = array<i32>} : memref<16x32xf32, #tpu.memory_space<vmem>>, vector<8x8xf32>,
    %100 = vector.extract_strided_slice %40 {offsets = [0, 24], sizes = [8, 8], strides = [1, 1]} : vector<16x32xbf16> to vector<8x8xbf16>
    %101 = vector.extract_strided_slice %43 {offsets = [24, 0], sizes = [8, 8], strides = [1, 1]} : vector<32x16xbf16> to vector<8x8xbf16>
    %cst_37 = arith.constant dense<0.000000e+00> : vector<8x8xf32>
    %102 = tpu.matmul %100, %101, %cst_37 {dimension_numbers = #tpu.dot_dimension_numbers<[1], [0], [0], [1], [0, 0, 1, 1], [], []>} : vector<8x8xbf16>, vector<8x8xbf16>, vector<8x8xf32> -> vector<8x8xf32>
    %103 = arith.addf %102, %4 : vector<8x8xf32>
    %cst_38 = arith.constant dense<0xFF800000> : vector<8xf32>
    %104 = vector.multi_reduction <maximumf>, %103, %cst_38 [1] : vector<8x8xf32> to vector<8xf32>
    %105 = vector.shape_cast %104 : vector<8xf32> to vector<8x1xf32>
    %106 = vector.broadcast %105 : vector<8x1xf32> to vector<8x8xf32>
    %107 = arith.subf %103, %106 : vector<8x8xf32>
    %108 = math.exp %107 : vector<8x8xf32>
    %cst_39 = arith.constant dense<0.000000e+00> : vector<8xf32>
    %109 = vector.multi_reduction <add>, %108, %cst_39 [1] : vector<8x8xf32> to vector<8xf32>
    %110 = vector.shape_cast %109 : vector<8xf32> to vector<8x1xf32>
    %111 = tpu.reciprocal %110 {approx = true} : vector<8x1xf32> -> vector<8x1xf32>
    %112 = vector.broadcast %111 : vector<8x1xf32> to vector<8x8xf32>
    %113 = arith.mulf %108, %112 : vector<8x8xf32>
    %114 = arith.truncf %113 : vector<8x8xf32> to vector<8x8xbf16>
    %115 = vector.extract_strided_slice %45 {offsets = [0, 24], sizes = [8, 8], strides = [1, 1]} : vector<16x32xbf16> to vector<8x8xbf16>
    %cst_40 = arith.constant dense<0.000000e+00> : vector<8x8xf32>
    %116 = tpu.matmul %114, %115, %cst_40 {dimension_numbers = #tpu.dot_dimension_numbers<[1], [0], [0], [1], [0, 0, 1, 1], [], []>} : vector<8x8xbf16>, vector<8x8xbf16>, vector<8x8xf32> -> vector<8x8xf32>
    %c0_41 = arith.constant 0 : index
    %c24 = arith.constant 24 : index
    %117 = vector.load %arg21[%c0_41, %c24] : memref<16x32xf32, #tpu.memory_space<vmem>>, vector<8x8xf32>
    tpu.vector_store %arg21[%c0_41, %c24], %116 {strides = array<i32>} : memref<16x32xf32, #tpu.memory_space<vmem>>, vector<8x8xf32>,
    %118 = vector.extract_strided_slice %40 {offsets = [8, 0], sizes = [8, 8], strides = [1, 1]} : vector<16x32xbf16> to vector<8x8xbf16>
    %119 = vector.extract_strided_slice %43 {offsets = [0, 8], sizes = [8, 8], strides = [1, 1]} : vector<32x16xbf16> to vector<8x8xbf16>
    %cst_42 = arith.constant dense<0.000000e+00> : vector<8x8xf32>
    %120 = tpu.matmul %118, %119, %cst_42 {dimension_numbers = #tpu.dot_dimension_numbers<[1], [0], [0], [1], [0, 0, 1, 1], [], []>} : vector<8x8xbf16>, vector<8x8xbf16>, vector<8x8xf32> -> vector<8x8xf32>
    %121 = arith.addf %120, %4 : vector<8x8xf32>
    %cst_43 = arith.constant dense<0xFF800000> : vector<8xf32>
    %122 = vector.multi_reduction <maximumf>, %121, %cst_43 [1] : vector<8x8xf32> to vector<8xf32>
    %123 = vector.shape_cast %122 : vector<8xf32> to vector<8x1xf32>
    %124 = vector.broadcast %123 : vector<8x1xf32> to vector<8x8xf32>
    %125 = arith.subf %121, %124 : vector<8x8xf32>
    %126 = math.exp %125 : vector<8x8xf32>
    %cst_44 = arith.constant dense<0.000000e+00> : vector<8xf32>
    %127 = vector.multi_reduction <add>, %126, %cst_44 [1] : vector<8x8xf32> to vector<8xf32>
    %128 = vector.shape_cast %127 : vector<8xf32> to vector<8x1xf32>
    %129 = tpu.reciprocal %128 {approx = true} : vector<8x1xf32> -> vector<8x1xf32>
    %130 = vector.broadcast %129 : vector<8x1xf32> to vector<8x8xf32>
    %131 = arith.mulf %126, %130 : vector<8x8xf32>
    %132 = arith.truncf %131 : vector<8x8xf32> to vector<8x8xbf16>
    %133 = vector.extract_strided_slice %45 {offsets = [8, 0], sizes = [8, 8], strides = [1, 1]} : vector<16x32xbf16> to vector<8x8xbf16>
    %cst_45 = arith.constant dense<0.000000e+00> : vector<8x8xf32>
    %134 = tpu.matmul %132, %133, %cst_45 {dimension_numbers = #tpu.dot_dimension_numbers<[1], [0], [0], [1], [0, 0, 1, 1], [], []>} : vector<8x8xbf16>, vector<8x8xbf16>, vector<8x8xf32> -> vector<8x8xf32>
    %c8_46 = arith.constant 8 : index
    %c0_47 = arith.constant 0 : index
    %135 = vector.load %arg21[%c8_46, %c0_47] : memref<16x32xf32, #tpu.memory_space<vmem>>, vector<8x8xf32>
    tpu.vector_store %arg21[%c8_46, %c0_47], %134 {strides = array<i32>} : memref<16x32xf32, #tpu.memory_space<vmem>>, vector<8x8xf32>,
    %136 = vector.extract_strided_slice %40 {offsets = [8, 8], sizes = [8, 8], strides = [1, 1]} : vector<16x32xbf16> to vector<8x8xbf16>
    %137 = vector.extract_strided_slice %43 {offsets = [8, 8], sizes = [8, 8], strides = [1, 1]} : vector<32x16xbf16> to vector<8x8xbf16>
    %cst_48 = arith.constant dense<0.000000e+00> : vector<8x8xf32>
    %138 = tpu.matmul %136, %137, %cst_48 {dimension_numbers = #tpu.dot_dimension_numbers<[1], [0], [0], [1], [0, 0, 1, 1], [], []>} : vector<8x8xbf16>, vector<8x8xbf16>, vector<8x8xf32> -> vector<8x8xf32>
    %139 = arith.addf %138, %4 : vector<8x8xf32>
    %cst_49 = arith.constant dense<0xFF800000> : vector<8xf32>
    %140 = vector.multi_reduction <maximumf>, %139, %cst_49 [1] : vector<8x8xf32> to vector<8xf32>
    %141 = vector.shape_cast %140 : vector<8xf32> to vector<8x1xf32>
    %142 = vector.broadcast %141 : vector<8x1xf32> to vector<8x8xf32>
    %143 = arith.subf %139, %142 : vector<8x8xf32>
    %144 = math.exp %143 : vector<8x8xf32>
    %cst_50 = arith.constant dense<0.000000e+00> : vector<8xf32>
    %145 = vector.multi_reduction <add>, %144, %cst_50 [1] : vector<8x8xf32> to vector<8xf32>
    %146 = vector.shape_cast %145 : vector<8xf32> to vector<8x1xf32>
    %147 = tpu.reciprocal %146 {approx = true} : vector<8x1xf32> -> vector<8x1xf32>
    %148 = vector.broadcast %147 : vector<8x1xf32> to vector<8x8xf32>
    %149 = arith.mulf %144, %148 : vector<8x8xf32>
    %150 = arith.truncf %149 : vector<8x8xf32> to vector<8x8xbf16>
    %151 = vector.extract_strided_slice %45 {offsets = [8, 8], sizes = [8, 8], strides = [1, 1]} : vector<16x32xbf16> to vector<8x8xbf16>
    %cst_51 = arith.constant dense<0.000000e+00> : vector<8x8xf32>
    %152 = tpu.matmul %150, %151, %cst_51 {dimension_numbers = #tpu.dot_dimension_numbers<[1], [0], [0], [1], [0, 0, 1, 1], [], []>} : vector<8x8xbf16>, vector<8x8xbf16>, vector<8x8xf32> -> vector<8x8xf32>
    %c8_52 = arith.constant 8 : index
    %c8_53 = arith.constant 8 : index
    %153 = vector.load %arg21[%c8_52, %c8_53] : memref<16x32xf32, #tpu.memory_space<vmem>>, vector<8x8xf32>
    tpu.vector_store %arg21[%c8_52, %c8_53], %152 {strides = array<i32>} : memref<16x32xf32, #tpu.memory_space<vmem>>, vector<8x8xf32>,
    %154 = vector.extract_strided_slice %40 {offsets = [8, 16], sizes = [8, 8], strides = [1, 1]} : vector<16x32xbf16> to vector<8x8xbf16>
    %155 = vector.extract_strided_slice %43 {offsets = [16, 8], sizes = [8, 8], strides = [1, 1]} : vector<32x16xbf16> to vector<8x8xbf16>
    %cst_54 = arith.constant dense<0.000000e+00> : vector<8x8xf32>
    %156 = tpu.matmul %154, %155, %cst_54 {dimension_numbers = #tpu.dot_dimension_numbers<[1], [0], [0], [1], [0, 0, 1, 1], [], []>} : vector<8x8xbf16>, vector<8x8xbf16>, vector<8x8xf32> -> vector<8x8xf32>
    %157 = arith.addf %156, %4 : vector<8x8xf32>
    %cst_55 = arith.constant dense<0xFF800000> : vector<8xf32>
    %158 = vector.multi_reduction <maximumf>, %157, %cst_55 [1] : vector<8x8xf32> to vector<8xf32>
    %159 = vector.shape_cast %158 : vector<8xf32> to vector<8x1xf32>
    %160 = vector.broadcast %159 : vector<8x1xf32> to vector<8x8xf32>
    %161 = arith.subf %157, %160 : vector<8x8xf32>
    %162 = math.exp %161 : vector<8x8xf32>
    %cst_56 = arith.constant dense<0.000000e+00> : vector<8xf32>
    %163 = vector.multi_reduction <add>, %162, %cst_56 [1] : vector<8x8xf32> to vector<8xf32>
    %164 = vector.shape_cast %163 : vector<8xf32> to vector<8x1xf32>
    %165 = tpu.reciprocal %164 {approx = true} : vector<8x1xf32> -> vector<8x1xf32>
    %166 = vector.broadcast %165 : vector<8x1xf32> to vector<8x8xf32>
    %167 = arith.mulf %162, %166 : vector<8x8xf32>
    %168 = arith.truncf %167 : vector<8x8xf32> to vector<8x8xbf16>
    %169 = vector.extract_strided_slice %45 {offsets = [8, 16], sizes = [8, 8], strides = [1, 1]} : vector<16x32xbf16> to vector<8x8xbf16>
    %cst_57 = arith.constant dense<0.000000e+00> : vector<8x8xf32>
    %170 = tpu.matmul %168, %169, %cst_57 {dimension_numbers = #tpu.dot_dimension_numbers<[1], [0], [0], [1], [0, 0, 1, 1], [], []>} : vector<8x8xbf16>, vector<8x8xbf16>, vector<8x8xf32> -> vector<8x8xf32>
    %c8_58 = arith.constant 8 : index
    %c16_59 = arith.constant 16 : index
    %171 = vector.load %arg21[%c8_58, %c16_59] : memref<16x32xf32, #tpu.memory_space<vmem>>, vector<8x8xf32>
    tpu.vector_store %arg21[%c8_58, %c16_59], %170 {strides = array<i32>} : memref<16x32xf32, #tpu.memory_space<vmem>>, vector<8x8xf32>,
    %172 = vector.extract_strided_slice %40 {offsets = [8, 24], sizes = [8, 8], strides = [1, 1]} : vector<16x32xbf16> to vector<8x8xbf16>
    %173 = vector.extract_strided_slice %43 {offsets = [24, 8], sizes = [8, 8], strides = [1, 1]} : vector<32x16xbf16> to vector<8x8xbf16>
    %cst_60 = arith.constant dense<0.000000e+00> : vector<8x8xf32>
    %174 = tpu.matmul %172, %173, %cst_60 {dimension_numbers = #tpu.dot_dimension_numbers<[1], [0], [0], [1], [0, 0, 1, 1], [], []>} : vector<8x8xbf16>, vector<8x8xbf16>, vector<8x8xf32> -> vector<8x8xf32>
    %175 = arith.addf %174, %4 : vector<8x8xf32>
    %cst_61 = arith.constant dense<0xFF800000> : vector<8xf32>
    %176 = vector.multi_reduction <maximumf>, %175, %cst_61 [1] : vector<8x8xf32> to vector<8xf32>
    %177 = vector.shape_cast %176 : vector<8xf32> to vector<8x1xf32>
    %178 = vector.broadcast %177 : vector<8x1xf32> to vector<8x8xf32>
    %179 = arith.subf %175, %178 : vector<8x8xf32>
    %180 = math.exp %179 : vector<8x8xf32>
    %cst_62 = arith.constant dense<0.000000e+00> : vector<8xf32>
    %181 = vector.multi_reduction <add>, %180, %cst_62 [1] : vector<8x8xf32> to vector<8xf32>
    %182 = vector.shape_cast %181 : vector<8xf32> to vector<8x1xf32>
    %183 = tpu.reciprocal %182 {approx = true} : vector<8x1xf32> -> vector<8x1xf32>
    %184 = vector.broadcast %183 : vector<8x1xf32> to vector<8x8xf32>
    %185 = arith.mulf %180, %184 : vector<8x8xf32>
    %186 = arith.truncf %185 : vector<8x8xf32> to vector<8x8xbf16>
    %187 = vector.extract_strided_slice %45 {offsets = [8, 24], sizes = [8, 8], strides = [1, 1]} : vector<16x32xbf16> to vector<8x8xbf16>
    %cst_63 = arith.constant dense<0.000000e+00> : vector<8x8xf32>
    %188 = tpu.matmul %186, %187, %cst_63 {dimension_numbers = #tpu.dot_dimension_numbers<[1], [0], [0], [1], [0, 0, 1, 1], [], []>} : vector<8x8xbf16>, vector<8x8xbf16>, vector<8x8xf32> -> vector<8x8xf32>
    %c8_64 = arith.constant 8 : index
    %c24_65 = arith.constant 24 : index
    %189 = vector.load %arg21[%c8_64, %c24_65] : memref<16x32xf32, #tpu.memory_space<vmem>>, vector<8x8xf32>
    tpu.vector_store %arg21[%c8_64, %c24_65], %188 {strides = array<i32>} : memref<16x32xf32, #tpu.memory_space<vmem>>, vector<8x8xf32>,
    %c0_66 = arith.constant 0 : index
    %c0_67 = arith.constant 0 : index
    %190 = vector.load %arg21[%c0_66, %c0_67] : memref<16x32xf32, #tpu.memory_space<vmem>>, vector<16x32xf32>
    %191 = arith.truncf %190 : vector<16x32xf32> to vector<16x32xbf16>
    %c0_68 = arith.constant 0 : index
    %c0_69 = arith.constant 0 : index
    %c0_70 = arith.constant 0 : index
    %192 = vector.load %arg8[%c0_68, %c0_69, %c0_70] : memref<1x32x32xbf16, #tpu.memory_space<vmem>>, vector<1x32x32xbf16>
    %193 = vector.shape_cast %192 : vector<1x32x32xbf16> to vector<32x32xbf16>
    %cst_71 = arith.constant dense<0.000000e+00> : vector<16x32xf32>
    %194 = tpu.matmul %191, %193, %cst_71 {dimension_numbers = #tpu.dot_dimension_numbers<[1], [0], [0], [1], [0, 0, 1, 1], [], []>} : vector<16x32xbf16>, vector<32x32xbf16>, vector<16x32xf32> -> vector<16x32xf32>
    %c0_72 = arith.constant 0 : index
    %c0_73 = arith.constant 0 : index
    %c0_74 = arith.constant 0 : index
    %195 = vector.load %arg9[%c0_72, %c0_73, %c0_74] : memref<1x1x32xf32, #tpu.memory_space<vmem>>, vector<1x1x32xf32>
    %196 = vector.shape_cast %195 : vector<1x1x32xf32> to vector<1x32xf32>
    %197 = vector.broadcast %196 : vector<1x32xf32> to vector<16x32xf32>
    %198 = arith.addf %194, %197 : vector<16x32xf32>
    %199 = arith.addf %3, %198 : vector<16x32xf32>
    %c0_75 = arith.constant 0 : index
    %c0_76 = arith.constant 0 : index
    %c0_77 = arith.constant 0 : index
    %200 = vector.load %arg10[%c0_75, %c0_76, %c0_77] : memref<1x1x32xf32, #tpu.memory_space<vmem>>, vector<1x1x32xf32>
    %201 = vector.shape_cast %200 : vector<1x1x32xf32> to vector<1x32xf32>
    %c0_78 = arith.constant 0 : index
    %c0_79 = arith.constant 0 : index
    %c0_80 = arith.constant 0 : index
    %202 = vector.load %arg11[%c0_78, %c0_79, %c0_80] : memref<1x1x32xf32, #tpu.memory_space<vmem>>, vector<1x1x32xf32>
    %203 = vector.shape_cast %202 : vector<1x1x32xf32> to vector<1x32xf32>
    %cst_81 = arith.constant dense<0.000000e+00> : vector<16xf32>
    %204 = vector.multi_reduction <add>, %199, %cst_81 [1] : vector<16x32xf32> to vector<16xf32>
    %205 = vector.shape_cast %204 : vector<16xf32> to vector<16x1xf32>
    %cst_82 = arith.constant 3.200000e+01 : f32
    %206 = vector.broadcast %cst_82 : f32 to vector<16x1xf32>
    %207 = arith.divf %205, %206 : vector<16x1xf32>
    %208 = vector.broadcast %207 : vector<16x1xf32> to vector<16x32xf32>
    %209 = arith.subf %199, %208 : vector<16x32xf32>
    %210 = arith.mulf %209, %209 : vector<16x32xf32>
    %cst_83 = arith.constant dense<0.000000e+00> : vector<16xf32>
    %211 = vector.multi_reduction <add>, %210, %cst_83 [1] : vector<16x32xf32> to vector<16xf32>
    %212 = vector.shape_cast %211 : vector<16xf32> to vector<16x1xf32>
    %cst_84 = arith.constant 3.200000e+01 : f32
    %213 = vector.broadcast %cst_84 : f32 to vector<16x1xf32>
    %214 = arith.divf %212, %213 : vector<16x1xf32>
    %215 = vector.broadcast %207 : vector<16x1xf32> to vector<16x32xf32>
    %216 = arith.subf %199, %215 : vector<16x32xf32>
    %cst_85 = arith.constant 9.99999974E-6 : f32
    %217 = vector.broadcast %cst_85 : f32 to vector<16x1xf32>
    %218 = arith.addf %214, %217 : vector<16x1xf32>
    %219 = math.rsqrt %218 : vector<16x1xf32>
    %220 = vector.broadcast %219 : vector<16x1xf32> to vector<16x32xf32>
    %221 = arith.mulf %216, %220 : vector<16x32xf32>
    %222 = vector.broadcast %201 : vector<1x32xf32> to vector<16x32xf32>
    %223 = arith.mulf %221, %222 : vector<16x32xf32>
    %224 = vector.broadcast %203 : vector<1x32xf32> to vector<16x32xf32>
    %225 = arith.addf %223, %224 : vector<16x32xf32>
    %226 = arith.truncf %225 : vector<16x32xf32> to vector<16x32xbf16>
    %c0_86 = arith.constant 0 : index
    %c0_87 = arith.constant 0 : index
    %c0_88 = arith.constant 0 : index
    %227 = vector.load %arg12[%c0_86, %c0_87, %c0_88] : memref<1x32x128xbf16, #tpu.memory_space<vmem>>, vector<1x32x128xbf16>
    %228 = vector.shape_cast %227 : vector<1x32x128xbf16> to vector<32x128xbf16>
    %cst_89 = arith.constant dense<0.000000e+00> : vector<16x128xf32>
    %229 = tpu.matmul %226, %228, %cst_89 {dimension_numbers = #tpu.dot_dimension_numbers<[1], [0], [0], [1], [0, 0, 1, 1], [], []>} : vector<16x32xbf16>, vector<32x128xbf16>, vector<16x128xf32> -> vector<16x128xf32>
    %c0_90 = arith.constant 0 : index
    %c0_91 = arith.constant 0 : index
    %c0_92 = arith.constant 0 : index
    %230 = vector.load %arg13[%c0_90, %c0_91, %c0_92] : memref<1x1x128xf32, #tpu.memory_space<vmem>>, vector<1x1x128xf32>
    %231 = vector.shape_cast %230 : vector<1x1x128xf32> to vector<1x128xf32>
    %232 = vector.broadcast %231 : vector<1x128xf32> to vector<16x128xf32>
    %233 = arith.addf %229, %232 : vector<16x128xf32>
    %cst_93 = arith.constant -1.702000e+00 : f32
    %234 = vector.broadcast %cst_93 : f32 to vector<16x128xf32>
    %235 = arith.mulf %234, %233 : vector<16x128xf32>
    %236 = math.exp %235 : vector<16x128xf32>
    %cst_94 = arith.constant 1.000000e+00 : f32
    %237 = vector.broadcast %cst_94 : f32 to vector<16x128xf32>
    %238 = arith.addf %237, %236 : vector<16x128xf32>
    %cst_95 = arith.constant 1.000000e+00 : f32
    %239 = vector.broadcast %cst_95 : f32 to vector<16x128xf32>
    %240 = arith.divf %239, %238 : vector<16x128xf32>
    %241 = arith.mulf %233, %240 : vector<16x128xf32>
    %242 = arith.truncf %241 : vector<16x128xf32> to vector<16x128xbf16>
    %c0_96 = arith.constant 0 : index
    %c0_97 = arith.constant 0 : index
    %c0_98 = arith.constant 0 : index
    %243 = vector.load %arg14[%c0_96, %c0_97, %c0_98] : memref<1x128x32xbf16, #tpu.memory_space<vmem>>, vector<1x128x32xbf16>
    %244 = vector.shape_cast %243 : vector<1x128x32xbf16> to vector<128x32xbf16>
    %cst_99 = arith.constant dense<0.000000e+00> : vector<16x32xf32>
    %245 = tpu.matmul %242, %244, %cst_99 {dimension_numbers = #tpu.dot_dimension_numbers<[1], [0], [0], [1], [0, 0, 1, 1], [], []>} : vector<16x128xbf16>, vector<128x32xbf16>, vector<16x32xf32> -> vector<16x32xf32>
    %c0_100 = arith.constant 0 : index
    %c0_101 = arith.constant 0 : index
    %c0_102 = arith.constant 0 : index
    %246 = vector.load %arg15[%c0_100, %c0_101, %c0_102] : memref<1x1x32xf32, #tpu.memory_space<vmem>>, vector<1x1x32xf32>
    %247 = vector.shape_cast %246 : vector<1x1x32xf32> to vector<1x32xf32>
    %248 = vector.broadcast %247 : vector<1x32xf32> to vector<16x32xf32>
    %249 = arith.addf %245, %248 : vector<16x32xf32>
    %250 = arith.addf %199, %249 : vector<16x32xf32>
    %c0_103 = arith.constant 0 : index
    %c0_104 = arith.constant 0 : index
    %251 = vector.load %arg20[%c0_103, %c0_104] : memref<16x32xf32, #tpu.memory_space<vmem>>, vector<16x32xf32>
    tpu.vector_store %arg20[%c0_103, %c0_104], %250 {strides = array<i32>} : memref<16x32xf32, #tpu.memory_space<vmem>>, vector<16x32xf32>,
    %c1_i32 = arith.constant 1 : i32
    %252 = arith.cmpi eq, %arg0, %c1_i32 : i32
    %253 = arith.extui %252 : i1 to i32
    %c0_i32_105 = arith.constant 0 : i32
    %254 = arith.cmpi ne, %253, %c0_i32_105 : i32
    scf.if %254 {
      %c0_106 = arith.constant 0 : index
      %255 = memref.load %arg1[%c0_106] : memref<2xi32, #tpu.memory_space<smem>>
      %c0_i32_107 = arith.constant 0 : i32
      %256 = arith.addi %c0_i32_107, %255 : i32
      %257 = arith.index_cast %256 : i32 to index
      %c0_108 = arith.constant 0 : index
      %258 = vector.load %arg20[%257, %c0_108] : memref<16x32xf32, #tpu.memory_space<vmem>>, vector<1x32xf32>
      %c1 = arith.constant 1 : index
      %259 = memref.load %arg1[%c1] : memref<2xi32, #tpu.memory_space<smem>>
      %c8_i32 = arith.constant 8 : i32
      %260 = arith.addi %c8_i32, %259 : i32
      %261 = arith.index_cast %260 : i32 to index
      %c0_109 = arith.constant 0 : index
      %262 = vector.load %arg20[%261, %c0_109] : memref<16x32xf32, #tpu.memory_space<vmem>>, vector<1x32xf32>
      %263 = tpu.concatenate %258, %262 in 0 : vector<1x32xf32>, vector<1x32xf32> -> vector<2x32xf32>
      %c0_110 = arith.constant 0 : index
      %c0_111 = arith.constant 0 : index
      %264 = vector.load %arg16[%c0_110, %c0_111] : memref<1x32xf32, #tpu.memory_space<vmem>>, vector<1x32xf32>
      %c0_112 = arith.constant 0 : index
      %c0_113 = arith.constant 0 : index
      %265 = vector.load %arg17[%c0_112, %c0_113] : memref<1x32xf32, #tpu.memory_space<vmem>>, vector<1x32xf32>
      %cst_114 = arith.constant dense<0.000000e+00> : vector<2xf32>
      %266 = vector.multi_reduction <add>, %263, %cst_114 [1] : vector<2x32xf32> to vector<2xf32>
      %267 = vector.shape_cast %266 : vector<2xf32> to vector<2x1xf32>
      %cst_115 = arith.constant 3.200000e+01 : f32
      %268 = vector.broadcast %cst_115 : f32 to vector<2x1xf32>
      %269 = arith.divf %267, %268 : vector<2x1xf32>
      %270 = vector.broadcast %269 : vector<2x1xf32> to vector<2x32xf32>
      %271 = arith.subf %263, %270 : vector<2x32xf32>
      %272 = arith.mulf %271, %271 : vector<2x32xf32>
      %cst_116 = arith.constant dense<0.000000e+00> : vector<2xf32>
      %273 = vector.multi_reduction <add>, %272, %cst_116 [1] : vector<2x32xf32> to vector<2xf32>
      %274 = vector.shape_cast %273 : vector<2xf32> to vector<2x1xf32>
      %cst_117 = arith.constant 3.200000e+01 : f32
      %275 = vector.broadcast %cst_117 : f32 to vector<2x1xf32>
      %276 = arith.divf %274, %275 : vector<2x1xf32>
      %277 = vector.broadcast %269 : vector<2x1xf32> to vector<2x32xf32>
      %278 = arith.subf %263, %277 : vector<2x32xf32>
      %cst_118 = arith.constant 9.99999974E-6 : f32
      %279 = vector.broadcast %cst_118 : f32 to vector<2x1xf32>
      %280 = arith.addf %276, %279 : vector<2x1xf32>
      %281 = math.rsqrt %280 : vector<2x1xf32>
      %282 = vector.broadcast %281 : vector<2x1xf32> to vector<2x32xf32>
      %283 = arith.mulf %278, %282 : vector<2x32xf32>
      %284 = vector.broadcast %264 : vector<1x32xf32> to vector<2x32xf32>
      %285 = arith.mulf %283, %284 : vector<2x32xf32>
      %286 = vector.broadcast %265 : vector<1x32xf32> to vector<2x32xf32>
      %287 = arith.addf %285, %286 : vector<2x32xf32>
      %288 = arith.truncf %287 : vector<2x32xf32> to vector<2x32xbf16>
      %c0_119 = arith.constant 0 : index
      %c0_120 = arith.constant 0 : index
      %289 = vector.load %arg18[%c0_119, %c0_120] : memref<32x128xbf16, #tpu.memory_space<vmem>>, vector<32x128xbf16>
      %cst_121 = arith.constant dense<0.000000e+00> : vector<2x128xf32>
      %290 = tpu.matmul %288, %289, %cst_121 {dimension_numbers = #tpu.dot_dimension_numbers<[1], [0], [0], [1], [0, 0, 1, 1], [], []>} : vector<2x32xbf16>, vector<32x128xbf16>, vector<2x128xf32> -> vector<2x128xf32>
      %c0_122 = arith.constant 0 : index
      %c0_123 = arith.constant 0 : index
      %291 = vector.load %arg19[%c0_122, %c0_123] : memref<2x128xf32, #tpu.memory_space<vmem>>, vector<2x128xf32>
      tpu.vector_store %arg19[%c0_122, %c0_123], %290 {strides = array<i32>} : memref<2x128xf32, #tpu.memory_space<vmem>>, vector<2x128xf32>,
    } else {
    }
    return
  }
  func.func @transform_0(%arg0: i32, %arg1: memref<2xi32, #tpu.memory_space<smem>>) -> (i32, i32) {
    %c0_i32 = arith.constant 0 : i32
    %c0_i32_0 = arith.constant 0 : i32
    %c0_i32_1 = arith.constant 0 : i32
    return %c0_i32, %c0_i32_0 : i32, i32
  }
  func.func @transform_1(%arg0: i32, %arg1: memref<2xi32, #tpu.memory_space<smem>>) -> (i32, i32) {
    %c0_i32 = arith.constant 0 : i32
    %c0_i32_0 = arith.constant 0 : i32
    %c0_i32_1 = arith.constant 0 : i32
    return %c0_i32, %c0_i32_0 : i32, i32
  }
  func.func @transform_2(%arg0: i32, %arg1: memref<2xi32, #tpu.memory_space<smem>>) -> (i32, i32, i32) {
    %c0_i32 = arith.constant 0 : i32
    %c0_i32_0 = arith.constant 0 : i32
    %c0_i32_1 = arith.constant 0 : i32
    return %arg0, %c0_i32, %c0_i32_0 : i32, i32, i32
  }
  func.func @transform_3(%arg0: i32, %arg1: memref<2xi32, #tpu.memory_space<smem>>) -> (i32, i32, i32) {
    %c0_i32 = arith.constant 0 : i32
    %c0_i32_0 = arith.constant 0 : i32
    %c0_i32_1 = arith.constant 0 : i32
    return %arg0, %c0_i32, %c0_i32_0 : i32, i32, i32
  }
  func.func @transform_4(%arg0: i32, %arg1: memref<2xi32, #tpu.memory_space<smem>>) -> (i32, i32, i32) {
    %c0_i32 = arith.constant 0 : i32
    %c0_i32_0 = arith.constant 0 : i32
    %c0_i32_1 = arith.constant 0 : i32
    return %arg0, %c0_i32, %c0_i32_0 : i32, i32, i32
  }
  func.func @transform_5(%arg0: i32, %arg1: memref<2xi32, #tpu.memory_space<smem>>) -> (i32, i32, i32) {
    %c0_i32 = arith.constant 0 : i32
    %c0_i32_0 = arith.constant 0 : i32
    %c0_i32_1 = arith.constant 0 : i32
    return %arg0, %c0_i32, %c0_i32_0 : i32, i32, i32
  }
  func.func @transform_6(%arg0: i32, %arg1: memref<2xi32, #tpu.memory_space<smem>>) -> (i32, i32, i32) {
    %c0_i32 = arith.constant 0 : i32
    %c0_i32_0 = arith.constant 0 : i32
    %c0_i32_1 = arith.constant 0 : i32
    return %arg0, %c0_i32, %c0_i32_0 : i32, i32, i32
  }
  func.func @transform_7(%arg0: i32, %arg1: memref<2xi32, #tpu.memory_space<smem>>) -> (i32, i32, i32) {
    %c0_i32 = arith.constant 0 : i32
    %c0_i32_0 = arith.constant 0 : i32
    %c0_i32_1 = arith.constant 0 : i32
    return %arg0, %c0_i32, %c0_i32_0 : i32, i32, i32
  }
  func.func @transform_8(%arg0: i32, %arg1: memref<2xi32, #tpu.memory_space<smem>>) -> (i32, i32, i32) {
    %c0_i32 = arith.constant 0 : i32
    %c0_i32_0 = arith.constant 0 : i32
    %c0_i32_1 = arith.constant 0 : i32
    return %arg0, %c0_i32, %c0_i32_0 : i32, i32, i32
  }
  func.func @transform_9(%arg0: i32, %arg1: memref<2xi32, #tpu.memory_space<smem>>) -> (i32, i32, i32) {
    %c0_i32 = arith.constant 0 : i32
    %c0_i32_0 = arith.constant 0 : i32
    %c0_i32_1 = arith.constant 0 : i32
    return %arg0, %c0_i32, %c0_i32_0 : i32, i32, i32
  }
  func.func @transform_10(%arg0: i32, %arg1: memref<2xi32, #tpu.memory_space<smem>>) -> (i32, i32, i32) {
    %c0_i32 = arith.constant 0 : i32
    %c0_i32_0 = arith.constant 0 : i32
    %c0_i32_1 = arith.constant 0 : i32
    return %arg0, %c0_i32, %c0_i32_0 : i32, i32, i32
  }
  func.func @transform_11(%arg0: i32, %arg1: memref<2xi32, #tpu.memory_space<smem>>) -> (i32, i32, i32) {
    %c0_i32 = arith.constant 0 : i32
    %c0_i32_0 = arith.constant 0 : i32
    %c0_i32_1 = arith.constant 0 : i32
    return %arg0, %c0_i32, %c0_i32_0 : i32, i32, i32
  }
  func.func @transform_12(%arg0: i32, %arg1: memref<2xi32, #tpu.memory_space<smem>>) -> (i32, i32, i32) {
    %c0_i32 = arith.constant 0 : i32
    %c0_i32_0 = arith.constant 0 : i32
    %c0_i32_1 = arith.constant 0 : i32
    return %arg0, %c0_i32, %c0_i32_0 : i32, i32, i32
  }
  func.func @transform_13(%arg0: i32, %arg1: memref<2xi32, #tpu.memory_space<smem>>) -> (i32, i32, i32) {
    %c0_i32 = arith.constant 0 : i32
    %c0_i32_0 = arith.constant 0 : i32
    %c0_i32_1 = arith.constant 0 : i32
    return %arg0, %c0_i32, %c0_i32_0 : i32, i32, i32
  }
  func.func @transform_14(%arg0: i32, %arg1: memref<2xi32, #tpu.memory_space<smem>>) -> (i32, i32) {
    %c0_i32 = arith.constant 0 : i32
    %c0_i32_0 = arith.constant 0 : i32
    %c0_i32_1 = arith.constant 0 : i32
    return %c0_i32, %c0_i32_0 : i32, i32
  }
  func.func @transform_15(%arg0: i32, %arg1: memref<2xi32, #tpu.memory_space<smem>>) -> (i32, i32) {
    %c0_i32 = arith.constant 0 : i32
    %c0_i32_0 = arith.constant 0 : i32
    %c0_i32_1 = arith.constant 0 : i32
    return %c0_i32, %c0_i32_0 : i32, i32
  }
  func.func @transform_16(%arg0: i32, %arg1: memref<2xi32, #tpu.memory_space<smem>>) -> (i32, i32) {
    %c0_i32 = arith.constant 0 : i32
    %c0_i32_0 = arith.constant 0 : i32
    %c0_i32_1 = arith.constant 0 : i32
    return %c0_i32, %c0_i32_0 : i32, i32
  }
  func.func @transform_17(%arg0: i32, %arg1: memref<2xi32, #tpu.memory_space<smem>>) -> (i32, i32) {
    %c0_i32 = arith.constant 0 : i32
    %c0_i32_0 = arith.constant 0 : i32
    %c0_i32_1 = arith.constant 0 : i32
    return %c0_i32, %c0_i32_0 : i32, i32
  }
}

</mosaic_0001>

<bundles_post_ra>
// kernel: tpu_custom_call.1
= control target key start
LH: loop header
LB: loop body
LE: loop exit
PB: predicated region body
PF: predicated region fallthrough
CT: control target
= control target key end

     0   :  { %s3337_s0 = inlined_call_operand.hbm [shape: s32[2], index: 0, kind: input, shape index: {}]   ;;  %s3338_s1 = inlined_call_operand.vmem [shape: f32[16,32], index: 1, kind: input, shape index: {}]   ;;  %s3339_s2 = inlined_call_operand.vmem [shape: f32[16,32], index: 2, kind: input, shape index: {}]   ;;  %s3340_s3 = inlined_call_operand.vmem [shape: f32[2,1,32], index: 3, kind: input, shape index: {}]   ;;  %s3341_s4 = inlined_call_operand.vmem [shape: f32[2,1,32], index: 4, kind: input, shape index: {}]   ;;  %s3342_s5 = inlined_call_operand.vmem [shape: bf16[2,32,96], index: 5, kind: input, shape index: {}]   ;;  %s3343_s6 = inlined_call_operand.vmem [shape: f32[2,1,96], index: 6, kind: input, shape index: {}]   ;;  %s3344_s7 = inlined_call_operand.vmem [shape: bf16[2,32,32], index: 7, kind: input, shape index: {}]   ;;  %s3345_s8 = inlined_call_operand.vmem [shape: f32[2,1,32], index: 8, kind: input, shape index: {}]   ;;  %s3346_s9 = inlined_call_operand.vmem [shape: f32[2,1,32], index: 9, kind: input, shape index: {}]   ;;  %s3347_s10 = inlined_call_operand.vmem [shape: f32[2,1,32], index: 10, kind: input, shape index: {}]   ;;  %s3348_s11 = inlined_call_operand.vmem [shape: bf16[2,32,128], index: 11, kind: input, shape index: {}]   ;;  %s3349_s12 = inlined_call_operand.vmem [shape: f32[2,1,128], index: 12, kind: input, shape index: {}]   ;;  %s3350_s13 = inlined_call_operand.vmem [shape: bf16[2,128,32], index: 13, kind: input, shape index: {}]   ;;  %s3351_s14 = inlined_call_operand.vmem [shape: f32[2,1,32], index: 14, kind: input, shape index: {}]   ;;  %s3352_s15 = inlined_call_operand.vmem [shape: f32[1,32], index: 15, kind: input, shape index: {}]   ;;  %s3353_s16 = inlined_call_operand.vmem [shape: f32[1,32], index: 16, kind: input, shape index: {}]   ;;  %s3354_s17 = inlined_call_operand.vmem [shape: bf16[32,128], index: 17, kind: input, shape index: {}]   ;;  %s3355_s18 = inlined_call_operand.hbm [shape: f32[2,128], index: 18, kind: output, shape index: {}]  }
   0x1   :  { %3362 = sst [smem:[#allocation12_spill]] %s3337_s0 }
   0x2   :  { %3363 = sst [smem:[#allocation13_spill]] %s3338_s1  ;;  %s3372_s29 = sld [smem:[#allocation12_spill]] }
   0x3   :  { %3364 = sst [smem:[#allocation14_spill]] %s3339_s2 }
   0x4   :  { %3365 = sst [smem:[#allocation15_spill]] %s3342_s5 }
   0x5   :  { %3366 = sst [smem:[#allocation16_spill]] %s3344_s7 }
   0x6   :  { %3367 = sst [smem:[#allocation17_spill]] %s3349_s12 }
   0x7   :  { %3368 = sst [smem:[#allocation18_spill]] %s3352_s15 }
   0x8   :  { %3369 = sst [smem:[#allocation19_spill]] %s3353_s16  ;;  %s2753_s12 = scalar_lea.hbm %s3372_s29, 16 }
   0x9   :  { %3370 = sst [smem:[#allocation20_spill]] %s3354_s17  ;;  %p2754_p0 = scmp.ne.s32.totalorder %s3372_s29, %s2753_s12 }
   0xa   :  { %3371 = sst [smem:[#allocation21_spill]] %s3355_s18  ;;  %p2757_p1 = scmp.lt.u32.totalorder %s2753_s12, %s3372_s29 }
   0xc   :  { %p2759_p2 = pnand %p2757_p1, %p2754_p0 }
   0xe   :  { %2762 = shalt.err (!%p2759_p2)  }
   0xf   :  { %s2803_s20 = smov [#allocation6]  }
  0x10   :  { %24 = dma.hbm_to_smem %s3372_s29, 16, %s2803_s20, [#allocation5] }
  0x11   :  { %2793 = dma.done.wait [#allocation5], 16 }
  0x12   :  { %2794 = vsyncadd [#allocation5], 4294967280 }
  0x13   :  { %26 = sfence }
  0x14   :  { %27 = vsyncpa [#allocation8], 0  ;;  %s2928_s2 = smov 0  }
  0x15 LB: > { %3373 = sst [smem:[#allocation11_spill]] %s2801_s2  ;;  %s2934_s12 = sadd.s32 4294967295, %s2801_s2   ;;  %s2801_s2 = sphi %s2928_s2, %s33_s2  }
  0x16   : > { %p2387_p3 = scmp.ge.s32.totalorder %s2801_s2, 1  ;;  %p582_p4 = scmp.lt.s32.totalorder %s2801_s2, 3 }
  0x18   : > { %p583_p5 = pnand %p2387_p3, %p582_p4 }
  0x19   : > { %p668_p6 = scmp.lt.s32.totalorder (!%p583_p5), %s2934_s12, 1  ;;  %s3374_s5 = sld [smem:[#allocation15_spill]] (!%p583_p5) }
  0x1a   : > { %586 = sbr.rel (%p583_p5) target bundleno = 3464 (0xd88), region = 88  ;;  %s3375_s7 = sld [smem:[#allocation16_spill]] (!%p583_p5) }
  0x1b   : > { %p2396_p7 = scmp.ne.s32.totalorder (!%p583_p5), %s2934_s12, 0 }
  0x21   : > { %s2940_s23 = scalar_select %p668_p6, %s2934_s12, 1 }
  0x22   : > { %s3377_s20 = sld [smem:[#allocation13_spill]] (!%p2396_p7)  ;;  %vm723_vm0 = vcmask (!%p2396_p7), 261120   ;;  %v726_v3 = vlaneseq (!%p2396_p7)  ;;  %vm732_vm1 = vcmask (!%p2396_p7), 64512   ;;  %v2804_v9 = vmov (!%p2396_p7), 0.0  }
  0x23   : > { %s2450_s30 = sshll.u32 %s2940_s23, 4  ;;  %s692_s16 = scalar_lea.vmem %s3346_s9, %s2940_s23 }
  0x24   : > { %s2958_s22 = scalar_lea.vmem %s3374_s5, %s2450_s30  ;;  %s2963_s2 = scalar_lea.vmem %s3375_s7, %s2450_s30  ;;  %v727_v7 = vshrl.u32 (!%p2396_p7), %v726_v3, 7  ;;  %v729_v8 = vand.u32 (!%p2396_p7), 127, %v726_v3 }
  0x25   : > { %s695_s1 = scalar_lea.vmem %s3347_s10, %s2940_s23  ;;  %s2980_s5 = scalar_lea.vmem %s3348_s11, %s2450_s30 }
  0x26   : > { %s3376_s7 = sld [smem:[#allocation17_spill]]  ;;  %s2453_s17 = sshll.u32 %s2940_s23, 6  ;;  %vm730_vm2 = vcmp.gt.s32.totalorder (!%p2396_p7), %v729_v8, %v727_v7 }
  0x27   : > { %s2990_s27 = scalar_lea.vmem %s3350_s13, %s2453_s17  ;;  %s711_s0 = scalar_lea.vmem %s3351_s14, %s2940_s23  ;;  %v731_v10 = vsel (!%p2396_p7), %vm730_vm2, -1e+30, %v2804_v9 }
  0x28   : > { %716 = sbr.rel (%p2396_p7) target bundleno = 54 (0x36), region = 92  ;;  %v717_v0 = vld [vmem:[%s3377_s20] sm:$0xff] (!%p2396_p7)  ;;  %v718_v2 = vld [vmem:[%s3377_s20 + $0x8] sm:$0xff] (!%p2396_p7)  ;;  %733 = vst.msk [vmem:[#allocation4] sm:$0xff] (!%p2396_p7), %vm732_vm1, %v731_v10 }
  0x2c   : > { %s703_s15 = scalar_lea.vmem %s3376_s7, %s2940_s23  ;;  %s3378_s7 = sld [smem:[#allocation14_spill]] (!%p2396_p7) }
  0x32   : > { %v719_v1 = vld [vmem:[%s3378_s7] sm:$0xff]  ;;  %v720_v5 = vld [vmem:[%s3378_s7 + $0x8] sm:$0xff] }
  0x33   : > { %v721_v4 = vadd.f32 %v719_v1, %v717_v0  ;;  %v722_v6 = vadd.f32 %v720_v5, %v718_v2 }
  0x35   : > { %724 = vst.msk [vmem:[#allocation2] sm:$0xff] %vm723_vm0, %v721_v4  ;;  %725 = vst.msk [vmem:[#allocation2 + $0x8] sm:$0xff] %vm723_vm0, %v722_v6 }
  0x36 PF: > { %vm739_vm3 = vcmask 261120   ;;  %v2687_v25 = vld [vmem:[%s2958_s22] sm:$0xff]   ;;  %v2805_v26 = vmov 0.0   ;;  %v2688_v27 = vld [vmem:[%s2958_s22 + $0x8] sm:$0xff]   ;;  %vm2806_vm4 = vmmov 0   ;;  %s3379_s28 = scalar_lea.vmem %s3340_s3, %s2940_s23  ;;  %s3380_s21 = scalar_lea.vmem %s3341_s4, %s2940_s23  ;;  %vm898_vm5 = vcmask 1043456  }
  0x37   : > { %2507 = vmatprep.subr.bf16.mxu1 %v2805_v26  ;;  %2527 = vmatprep.subr.bf16.mxu0 %v2805_v26  ;;  %v2397_v36 = vld [vmem:[%s3379_s28] ss:$0 sm:$0xff]  ;;  %s3381_s18 = scalar_lea.vmem %s3343_s6, %s2940_s23  ;;  %s2807_s17 = smov 96   ;;  %vm894_vm6 = vcmask 64512   ;;  %vm1118_vm7 = vcmask 130112   ;;  %vm1232_vm8 = vcmask 195712  }
  0x38   : > { %2508 = vmatpush3.bf16.msra.mxu1 %v2687_v25  ;;  %2511 = vmatprep.mubr.msk.bf16.mxu1 %vm2806_vm4, %v2805_v26  ;;  %v2398_v40 = vld [vmem:[%s3380_s21] ss:$0 sm:$0xff]  ;;  %s2808_s26 = smov 120   ;;  %s2809_s22 = smov 112   ;;  %vm1348_vm9 = vcmask 261312  }
  0x39   : > { %2509 = vmatprep.subr.bf16.mxu1 %v2805_v26  ;;  %2529 = vmatprep.mubr.msk.bf16.mxu0 %vm2806_vm4, %v2805_v26  ;;  %v2399_v45 = vld [vmem:[%s3381_s18] ss:$0 sm:$0xff]  ;;  %s2810_s29 = smov 104   ;;  %s2811_s28 = smov 64  }
  0x3a   : > { %s2812_s19 = smov 56   ;;  %s2813_s30 = smov 48  }
  0x3b   : > { %s2814_s21 = smov 40   ;;  %s2815_s24 = smov 8  }
  0x3c   : > { %v3009_v11 = vld [vmem:[#allocation2] sm:$0xff]  ;;  %v3011_v12 = vld [vmem:[#allocation2 + $0x8] sm:$0xff]  ;;  %2510 = vmatpush3.bf16.msra.mxu1 %v2688_v27  ;;  %s2816_s25 = smov 16   ;;  %s2817_s18 = smov 24  }
  0x3d   : > { %v740_v13 = vsel %vm739_vm3, %v3009_v11, 0.0  ;;  %v743_v14 = vsel %vm739_vm3, %v3011_v12, 0.0  ;;  %2515 = vmatprep.subr.bf16.mxu1 %v2805_v26  ;;  %p2438_p8 = scmp.ne.s32.totalorder %s2934_s12, 1 }
  0x3e   : > { %741 = vadd.xlane.f32.xlu0 %v740_v13  ;;  %vm2134_vm10 = vcmask (!%p2438_p8), 1040384   ;;  %vm2138_vm11 = vcmask (!%p2438_p8), 254976   ;;  %vm2819_vm12 = vmmov (!%p2438_p8), 0  }
  0x42   : > { %744 = vadd.xlane.f32.xlu0 %v743_v14 }
  0xcb   : > { %v742_v15 = vpop.xlane.xlu0 %741 }
  0xcc   : > { %v747_v16 = vmul.f32 0.03125, %v742_v15 }
  0xce   : > { %v749_v17 = vsub.f32 %v3009_v11, %v747_v16 }
  0xcf   : > { %v745_v18 = vpop.xlane.xlu0 %744 }
  0xd0   : > { %v748_v19 = vmul.f32 0.03125, %v745_v18  ;;  %v751_v20 = vmul.f32 %v749_v17, %v749_v17 }
  0xd2   : > { %v750_v21 = vsub.f32 %v3011_v12, %v748_v19  ;;  %v753_v22 = vsel %vm739_vm3, %v751_v20, 0.0 }
  0xd3   : > { %754 = vadd.xlane.f32.xlu1 %v753_v22  ;;  %v736_v22 = vld [vmem:[#allocation4] sm:$0xff] }
  0xd4   : > { %v752_v23 = vmul.f32 %v750_v21, %v750_v21 }
  0xd6   : > { %v756_v24 = vsel %vm739_vm3, %v752_v23, 0.0 }
  0xd7   : > { %757 = vadd.xlane.f32.xlu1 %v756_v24 }
 0x160   : > { %v755_v28 = vpop.xlane.xlu1 %754 }
 0x161   : > { %v759_v29 = vmul.f32 0.03125, %v755_v28 }
 0x163   : > { %v761_v30 = vadd.f32 1e-05, %v759_v29 }
 0x164   : > { %v758_v31 = vpop.xlane.xlu1 %757 }
 0x165   : > { %2701 = vrsqrt.f32 %v761_v30  ;;  %v760_v32 = vmul.f32 0.03125, %v758_v31 }
 0x167   : > { %v762_v33 = vadd.f32 1e-05, %v760_v32 }
 0x169   : > { %2703 = vrsqrt.f32 %v762_v33 }
 0x16f   : > { %v2702_v34 = vpop.eup %2701 }
 0x170   : > { %v765_v35 = vmul.f32 %v2702_v34, %v749_v17 }
 0x172   : > { %v773_v39 = vmul.f32 %v2397_v36, %v765_v35 }
 0x173   : > { %v2704_v37 = vpop.eup %2703 }
 0x174   : > { %v766_v38 = vmul.f32 %v2704_v37, %v750_v21  ;;  %v781_v42 = vadd.f32 %v2398_v40, %v773_v39 }
 0x176   : > { %v774_v41 = vmul.f32 %v2397_v36, %v766_v38 }
 0x178   : > { %v782_v43 = vadd.f32 %v2398_v40, %v774_v41 }
 0x17a   : > { %v783_v44 = vpack.c.bf16 %v782_v43, %v781_v42 }
 0x17c   : > { %2512 = vmatmul.mubr.msk.bf16.vlgmr.msra.gmra.mrb[0].mxu1 %vm739_vm3, %v783_v44 }
 0x17d   : > { %2517 = vmatprep.mubr.msk.bf16.mxu1 %vm2806_vm4, %v2805_v26 }
 0x24f   : > { %v844_v46 = vpop.f32.mrb[0].mxu1 }
 0x250   : > { %v845_v47 = vadd.f32 %v2399_v45, %v844_v46  ;;  %v2513_v48 = vpop.f32.mrb[1].mxu1 }
 0x251   : > { %v847_v49 = vpop.f32.mrb[2].mxu1 }
 0x252   : > { %v848_v50 = vadd.f32 %v2399_v45, %v847_v49  ;;  %854 = vrot.lane.b32.xlu0 %v845_v47, %s2807_s17  ;;  %v2514_v51 = vpop.f32.mrb[3].mxu1 }
 0x254   : > { %v3049_v52 = vpack.c.bf16 %v848_v50, %v845_v47  ;;  %856 = vrot.lane.b32.xlu1 %v848_v50, %s2807_s17 }
 0x256   : > { %1004 = vrot.lane.b32.xlu0 %v3049_v52, %s2808_s26  ;;  %v3069_v1 = vrot.slane %v3049_v52, 4 }
 0x25a   : > { %1120 = vrot.lane.b32.xlu0 %v3049_v52, %s2809_s22 }
 0x25e   : > { %1234 = vrot.lane.b32.xlu0 %v3049_v52, %s2810_s29 }
 0x2c4   : > { %v855_v53 = vpop.permute.xlu0 %854 }
 0x2c5   : > { %860 = vxpose.xlu1.b32.start [1/2] (short) (narrow) %v855_v53, 32 }
 0x2c6   : > { %v857_v54 = vpop.permute.xlu1 %856 }
 0x2c8   : > { %v1005_v62 = vpop.permute.xlu0 %1004 }
 0x2c9   : > { %861 = vxpose.xlu1.b32.end [2/2] (short) (narrow) %v857_v54, 32 }
 0x2cc   : > { %v1121_v5 = vpop.permute.xlu0 %1120 }
 0x2d0   : > { %v1235_v6 = vpop.permute.xlu0 %1234 }
 0x345   : > { %v876_v55 = vpop.trf.xlu1 }
 0x349   : > { %v877_v56 = vpop.trf.xlu1 }
 0x34a   : > { %v892_v57 = vpack.c.bf16 %v877_v56, %v876_v55 }
 0x34c   : > { %1351 = vrot.lane.b32.xlu0 %v892_v57, %s2808_s26  ;;  %v900_v58 = vsel %vm898_vm5, %v892_v57, 0  ;;  %v1007_v59 = vrot.slane %v892_v57, 4 }
 0x34d   : > { %2516 = vmatpush3.bf16.msra.mxu1 %v900_v58  ;;  %v878_v60 = vpop.trf.xlu1 }
 0x34e   : > { %v1012_v61 = vsel %vm898_vm5, %v1007_v59, 0  ;;  %2521 = vmatprep.subr.bf16.mxu1 %v2805_v26 }
 0x34f   : > { %2528 = vmatpush3.bf16.msra.mxu0 %v1012_v61 }
 0x350   : > { %1462 = vrot.lane.b32.xlu0 %v1007_v59, %s2808_s26  ;;  %2518 = vmatmul.mubr.msk.bf16.vlgmr.msra.gmra.mrb[4].mxu1 %vm894_vm6, %v3049_v52 }
 0x351   : > { %v879_v63 = vpop.trf.xlu1  ;;  %2539 = vmatprep.subr.bf16.mxu0 %v2805_v26  ;;  %2523 = vmatprep.mubr.msk.bf16.mxu1 %vm2806_vm4, %v2805_v26 }
 0x352   : > { %2530 = vmatmul.mubr.msk.bf16.vlgmr.msra.gmra.mrb[0].mxu0 %vm894_vm6, %v1005_v62  ;;  %v893_v0 = vpack.c.bf16 %v879_v63, %v878_v60 }
 0x353   : > { %2541 = vmatprep.mubr.msk.bf16.mxu0 %vm2806_vm4, %v2805_v26 }
 0x354   : > { %v1237_v2 = vrot.slane %v893_v0, 4  ;;  %1460 = vrot.lane.b32.xlu0 %v3069_v1, %s2808_s26  ;;  %v1126_v3 = vsel %vm898_vm5, %v893_v0, 0 }
 0x355   : > { %2540 = vmatpush3.bf16.msra.mxu0 %v1126_v3 }
 0x356   : > { %2551 = vmatprep.subr.bf16.mxu0 %v2805_v26  ;;  %v1242_v4 = vsel %vm898_vm5, %v1237_v2, 0 }
 0x358   : > { %1577 = vrot.lane.b32.xlu0 %v893_v0, %s2808_s26 }
 0x35a   : > { %2542 = vmatmul.mubr.msk.bf16.vlgmr.msra.gmra.mrb[4].mxu0 %vm894_vm6, %v1121_v5 }
 0x35b   : > { %2552 = vmatpush3.bf16.msra.mxu0 %v1242_v4  ;;  %2553 = vmatprep.mubr.msk.bf16.mxu0 %vm2806_vm4, %v2805_v26 }
 0x35c   : > { %1575 = vrot.lane.b32.xlu0 %v3069_v1, %s2809_s22  ;;  %2563 = vmatprep.subr.bf16.mxu0 %v2805_v26 }
 0x360   : > { %1692 = vrot.lane.b32.xlu0 %v1237_v2, %s2808_s26  ;;  %s3382_s26 = scalar_lea.vmem %s3345_s8, %s2940_s23  ;;  %s2439_s23 = sld [smem:[#allocation6 + $0x1]] (!%p2438_p8) }
 0x362   : > { %2554 = vmatmul.mubr.msk.bf16.vlgmr.msra.gmra.mrb[8].mxu0 %vm894_vm6, %v1235_v6 }
 0x363   : > { %2565 = vmatprep.mubr.msk.bf16.mxu0 %vm2806_vm4, %v2805_v26 }
 0x364   : > { %1690 = vrot.lane.b32.xlu0 %v3069_v1, %s2810_s29  ;;  %s3385_s29 = sld [smem:[#allocation18_spill]] (!%p2438_p8) }
 0x368   : > { %955 = vrot.lane.b32.xlu0 %v3049_v52, %s2811_s28 }
 0x3be   : > { %v1352_v7 = vpop.permute.xlu0 %1351 }
 0x3bf   : > { %v1357_v8 = vsel %vm898_vm5, %v1352_v7, 0 }
 0x3c0   : > { %2564 = vmatpush3.bf16.msra.mxu0 %v1357_v8 }
 0x3c1   : > { %2575 = vmatprep.subr.bf16.mxu0 %v2805_v26 }
 0x3c2   : > { %v1463_v9 = vpop.permute.xlu0 %1462 }
 0x3c3   : > { %v1468_v10 = vsel %vm898_vm5, %v1463_v9, 0  ;;  %2566 = vmatmul.mubr.msk.bf16.vlgmr.msra.gmra.mrb[12].mxu0 %vm894_vm6, %v3069_v1 }
 0x3c4   : > { %2576 = vmatpush3.bf16.msra.mxu0 %v1468_v10  ;;  %2577 = vmatprep.mubr.msk.bf16.mxu0 %vm2806_vm4, %v2805_v26 }
 0x3c5   : > { %2587 = vmatprep.subr.bf16.mxu0 %v2805_v26 }
 0x3c6   : > { %v1461_v13 = vpop.permute.xlu0 %1460 }
 0x3ca   : > { %v1578_v14 = vpop.permute.xlu0 %1577 }
 0x3cb   : > { %v1583_v15 = vsel %vm898_vm5, %v1578_v14, 0  ;;  %2578 = vmatmul.mubr.msk.bf16.vlgmr.msra.gmra.mrb[16].mxu0 %vm894_vm6, %v1461_v13 }
 0x3cc   : > { %2588 = vmatpush3.bf16.msra.mxu0 %v1583_v15  ;;  %2589 = vmatprep.mubr.msk.bf16.mxu0 %vm2806_vm4, %v2805_v26 }
 0x3cd   : > { %2599 = vmatprep.subr.bf16.mxu0 %v2805_v26 }
 0x3ce   : > { %v1576_v16 = vpop.permute.xlu0 %1575 }
 0x3d2   : > { %v1693_v17 = vpop.permute.xlu0 %1692 }
 0x3d3   : > { %v1698_v18 = vsel %vm898_vm5, %v1693_v17, 0  ;;  %2590 = vmatmul.mubr.msk.bf16.vlgmr.msra.gmra.mrb[20].mxu0 %vm894_vm6, %v1576_v16 }
 0x3d4   : > { %2600 = vmatpush3.bf16.msra.mxu0 %v1698_v18  ;;  %2601 = vmatprep.mubr.msk.bf16.mxu0 %vm2806_vm4, %v2805_v26 }
 0x3d5   : > { %2611 = vmatprep.subr.bf16.mxu0 %v2805_v26 }
 0x3d6   : > { %v1691_v19 = vpop.permute.xlu0 %1690 }
 0x3da   : > { %v956_v20 = vpop.permute.xlu0 %955 }
 0x3db   : > { %v961_v21 = vsel %vm898_vm5, %v956_v20, 0  ;;  %2602 = vmatmul.mubr.msk.bf16.vlgmr.msra.gmra.mrb[24].mxu0 %vm894_vm6, %v1691_v19 }
 0x3dc   : > { %2522 = vmatpush3.bf16.msra.mxu1 %v961_v21  ;;  %2615 = vmatprep.mubr.msk.bf16.mxu0 %vm2806_vm4, %v2805_v26 }
 0x3dd   : > { %2533 = vmatprep.subr.bf16.mxu1 %v2805_v26 }
 0x423   : > { %v936_v23 = vpop.f32.mrb[4].mxu1 }
 0x424   : > { %v3116_v24 = vadd.f32 %v936_v23, %v736_v22  ;;  %v2519_v25 = vpop.f32.mrb[5].mxu1 }
 0x425   : > { %v939_v27 = vpop.f32.mrb[6].mxu1  ;;  %v1048_v28 = vpop.f32.mrb[0].mxu0 }
 0x426   : > { %v1049_v29 = vadd.f32 %v1048_v28, %v736_v22  ;;  %v2520_v30 = vpop.f32.mrb[7].mxu1  ;;  %v2531_v31 = vpop.f32.mrb[1].mxu0  ;;  %v942_v32 = vsel %vm894_vm6, %v3116_v24, -inf }
 0x427   : > { %v1051_v33 = vpop.f32.mrb[2].mxu0  ;;  %943 = vmax.xlane.f32.xlu0 %v942_v32 }
 0x428   : > { %v2532_v34 = vpop.f32.mrb[3].mxu0  ;;  %v1054_v35 = vsel %vm894_vm6, %v1049_v29, -inf }
 0x429   : > { %1055 = vmax.xlane.f32.xlu1 %v1054_v35 }
 0x42d   : > { %v1162_v36 = vpop.f32.mrb[4].mxu0 }
 0x42e   : > { %v1163_v37 = vadd.f32 %v1162_v36, %v736_v22  ;;  %v2543_v38 = vpop.f32.mrb[5].mxu0 }
 0x42f   : > { %v1165_v39 = vpop.f32.mrb[6].mxu0 }
 0x430   : > { %v2544_v40 = vpop.f32.mrb[7].mxu0  ;;  %v1168_v41 = vsel %vm894_vm6, %v1163_v37, -inf }
 0x431   : > { %1169 = vmax.xlane.f32.xlu0 %v1168_v41 }
 0x435   : > { %v1278_v42 = vpop.f32.mrb[8].mxu0 }
 0x436   : > { %v1279_v43 = vadd.f32 %v1278_v42, %v736_v22  ;;  %v2555_v44 = vpop.f32.mrb[9].mxu0 }
 0x437   : > { %v1281_v45 = vpop.f32.mrb[10].mxu0 }
 0x438   : > { %v2556_v46 = vpop.f32.mrb[11].mxu0  ;;  %v1284_v47 = vsel %vm894_vm6, %v1279_v43, -inf }
 0x439   : > { %1285 = vmax.xlane.f32.xlu0 %v1284_v47 }
 0x43a   : > { %1066 = vrot.lane.b32.xlu1 %v3049_v52, %s2812_s19 }
 0x496   : > { %v1393_v48 = vpop.f32.mrb[12].mxu0 }
 0x497   : > { %v1394_v49 = vadd.f32 %v1393_v48, %v736_v22  ;;  %v2567_v50 = vpop.f32.mrb[13].mxu0 }
 0x498   : > { %v1396_v51 = vpop.f32.mrb[14].mxu0 }
 0x499   : > { %v2568_v53 = vpop.f32.mrb[15].mxu0  ;;  %v1399_v54 = vsel %vm894_vm6, %v1394_v49, -inf }
 0x49a   : > { %1400 = vmax.xlane.f32.xlu0 %v1399_v54 }
 0x49e   : > { %v1504_v55 = vpop.f32.mrb[16].mxu0 }
 0x49f   : > { %v1505_v56 = vadd.f32 %v1504_v55, %v736_v22  ;;  %v2579_v57 = vpop.f32.mrb[17].mxu0 }
 0x4a0   : > { %v1507_v58 = vpop.f32.mrb[18].mxu0 }
 0x4a1   : > { %v2580_v59 = vpop.f32.mrb[19].mxu0  ;;  %v1510_v60 = vsel %vm894_vm6, %v1505_v56, -inf }
 0x4a2   : > { %1511 = vmax.xlane.f32.xlu0 %v1510_v60 }
 0x4a6   : > { %v1619_v61 = vpop.f32.mrb[20].mxu0 }
 0x4a7   : > { %v1620_v62 = vadd.f32 %v1619_v61, %v736_v22  ;;  %v2591_v63 = vpop.f32.mrb[21].mxu0 }
 0x4a8   : > { %v1622_v0 = vpop.f32.mrb[22].mxu0 }
 0x4a9   : > { %v2592_v2 = vpop.f32.mrb[23].mxu0  ;;  %v1625_v3 = vsel %vm894_vm6, %v1620_v62, -inf }
 0x4aa   : > { %1626 = vmax.xlane.f32.xlu0 %v1625_v3 }
 0x4ae   : > { %v1734_v4 = vpop.f32.mrb[24].mxu0 }
 0x4af   : > { %v3128_v5 = vadd.f32 %v1734_v4, %v736_v22  ;;  %v2603_v6 = vpop.f32.mrb[25].mxu0 }
 0x4b0   : > { %v1737_v7 = vpop.f32.mrb[26].mxu0 }
 0x4b1   : > { %v2604_v8 = vpop.f32.mrb[27].mxu0  ;;  %v1740_v9 = vsel %vm894_vm6, %v3128_v5, -inf }
 0x4b2   : > { %1741 = vmax.xlane.f32.xlu1 %v1740_v9 }
 0x4b4   : > { %v944_v16 = vpop.xlane.xlu0 %943 }
 0x4b5   : > { %v945_v18 = vsub.f32 %v3116_v24, %v944_v16 }
 0x4b6   : > { %v1056_v10 = vpop.xlane.xlu1 %1055 }
 0x4b7   : > { %v1057_v13 = vsub.f32 %v1049_v29, %v1056_v10  ;;  %v946_v20 = vmul.f32 1.442695, %v945_v18 }
 0x4b9   : > { %v1058_v14 = vmul.f32 1.442695, %v1057_v13 }
 0x4ba   : > { %v1067_v47 = vpop.permute.xlu1 %1066 }
 0x4bb   : > { %2705 = vpow2.f32 %v1058_v14 }
 0x4bc   : > { %2707 = vpow2.f32 %v946_v20 }
 0x4be   : > { %v1170_v19 = vpop.xlane.xlu0 %1169 }
 0x4bf   : > { %v1171_v21 = vsub.f32 %v1163_v37, %v1170_v19 }
 0x4c0   : > { %1180 = vrot.lane.b32.xlu0 %v3049_v52, %s2813_s30 }
 0x4c1   : > { %v1172_v22 = vmul.f32 1.442695, %v1171_v21 }
 0x4c3   : > { %2709 = vpow2.f32 %v1172_v22 }
 0x4c5   : > { %v3134_v15 = vpop.eup %2705 }
 0x4c6   : > { %v1060_v17 = vsel %vm894_vm6, %v3134_v15, 0.0  ;;  %v2708_v23 = vpop.eup %2707  ;;  %v1286_v29 = vpop.xlane.xlu0 %1285 }
 0x4c7   : > { %1061 = vadd.xlane.f32.xlu1 %v1060_v17  ;;  %v948_v25 = vsel %vm894_vm6, %v2708_v23, 0.0  ;;  %v1287_v24 = vsub.f32 %v1279_v43, %v1286_v29 }
 0x4c9   : > { %v1288_v30 = vmul.f32 1.442695, %v1287_v24 }
 0x4cb   : > { %2711 = vpow2.f32 %v1288_v30 }
 0x4cd   : > { %v3142_v27 = vpop.eup %2709 }
 0x4ce   : > { %v1174_v28 = vsel %vm894_vm6, %v3142_v27, 0.0 }
 0x4d5   : > { %v3146_v31 = vpop.eup %2711 }
 0x4d6   : > { %v1290_v32 = vsel %vm894_vm6, %v3146_v31, 0.0 }
 0x4d8   : > { %1411 = vrot.lane.b32.xlu1 %v3069_v1, %s2811_s28 }
 0x4df   : > { %949 = vadd.xlane.f32.xlu0 %v948_v25 }
 0x4e3   : > { %1175 = vadd.xlane.f32.xlu0 %v1174_v28 }
 0x4f9   : > { %1296 = vrot.lane.b32.xlu0 %v3049_v52, %s2814_s21 }
 0x4fc   : > { %1291 = vadd.xlane.f32.xlu1 %v1290_v32 }
 0x527   : > { %v1401_v33 = vpop.xlane.xlu0 %1400 }
 0x528   : > { %v1402_v34 = vsub.f32 %v1394_v49, %v1401_v33 }
 0x52a   : > { %v1403_v35 = vmul.f32 1.442695, %v1402_v34 }
 0x52c   : > { %2713 = vpow2.f32 %v1403_v35 }
 0x52f   : > { %v1512_v36 = vpop.xlane.xlu0 %1511 }
 0x530   : > { %v1513_v37 = vsub.f32 %v1505_v56, %v1512_v36 }
 0x532   : > { %v1514_v38 = vmul.f32 1.442695, %v1513_v37 }
 0x534   : > { %2715 = vpow2.f32 %v1514_v38 }
 0x536   : > { %v3152_v39 = vpop.eup %2713 }
 0x537   : > { %v1627_v40 = vpop.xlane.xlu0 %1626  ;;  %v1405_v41 = vsel %vm894_vm6, %v3152_v39, 0.0 }
 0x538   : > { %v1628_v42 = vsub.f32 %v1620_v62, %v1627_v40  ;;  %1406 = vadd.xlane.f32.xlu1 %v1405_v41  ;;  %v1072_v62 = vsel %vm898_vm5, %v1067_v47, 0 }
 0x53a   : > { %v1629_v52 = vmul.f32 1.442695, %v1628_v42 }
 0x53b   : > { %v1181_v51 = vpop.permute.xlu0 %1180 }
 0x53c   : > { %2717 = vpow2.f32 %v1629_v52  ;;  %v1186_v3 = vsel %vm898_vm5, %v1181_v51, 0 }
 0x53e   : > { %v3156_v43 = vpop.eup %2715 }
 0x53f   : > { %v1516_v44 = vsel %vm894_vm6, %v3156_v43, 0.0  ;;  %v1742_v48 = vpop.xlane.xlu1 %1741 }
 0x540   : > { %1517 = vadd.xlane.f32.xlu1 %v1516_v44  ;;  %v1743_v49 = vsub.f32 %v3128_v5, %v1742_v48 }
 0x542   : > { %v1744_v50 = vmul.f32 1.442695, %v1743_v49 }
 0x544   : > { %2719 = vpow2.f32 %v1744_v50 }
 0x546   : > { %v3160_v45 = vpop.eup %2717 }
 0x547   : > { %v1631_v46 = vsel %vm894_vm6, %v3160_v45, 0.0 }
 0x548   : > { %1632 = vadd.xlane.f32.xlu0 %v1631_v46 }
 0x54e   : > { %v3169_v55 = vpop.eup %2719 }
 0x54f   : > { %v1746_v56 = vsel %vm894_vm6, %v3169_v55, 0.0 }
 0x551   : > { %1522 = vrot.lane.b32.xlu1 %v3069_v1, %s2812_s19 }
 0x554   : > { %v1062_v54 = vpop.xlane.xlu1 %1061 }
 0x558   : > { %v1412_v4 = vpop.permute.xlu1 %1411 }
 0x559   : > { %v1417_v14 = vsel %vm898_vm5, %v1412_v4, 0 }
 0x55e   : > { %1637 = vrot.lane.b32.xlu0 %v3069_v1, %s2813_s30  ;;  %s2124_s30 = sld [smem:[#allocation6]] (!%p2438_p8) }
 0x56c   : > { %v950_v53 = vpop.xlane.xlu0 %949 }
 0x56d   : > { %2721 = vrcp.f32 %v950_v53 }
 0x56e   : > { %2723 = vrcp.f32 %v1062_v54 }
 0x570   : > { %v1176_v57 = vpop.xlane.xlu0 %1175 }
 0x571   : > { %2725 = vrcp.f32 %v1176_v57 }
 0x574   : > { %v1297_v6 = vpop.permute.xlu0 %1296 }
 0x575   : > { %1747 = vadd.xlane.f32.xlu1 %v1746_v56  ;;  %v1302_v9 = vsel %vm898_vm5, %v1297_v6, 0  ;;  %v2690_v6 = vld [vmem:[%s2963_s2 + $0x8] sm:$0xff]  }
 0x577   : > { %v2722_v58 = vpop.eup %2721 }
 0x578   : > { %v952_v59 = vmul.f32 %v2722_v58, %v2708_v23  ;;  %v2724_v61 = vpop.eup %2723 }
 0x579   : > { %v1064_v63 = vmul.f32 %v2724_v61, %v3134_v15 }
 0x57a   : > { %v953_v60 = vpack.c.bf16 %v952_v59, %v952_v59 }
 0x57b   : > { %v1065_v0 = vpack.c.bf16 %v1064_v63, %v1064_v63  ;;  %v2726_v2 = vpop.eup %2725 }
 0x57c   : > { %2524 = vmatmul.mubr.msk.bf16.vlgmr.msra.gmra.mrb[8].mxu1 %vm894_vm6, %v953_v60  ;;  %v1178_v5 = vmul.f32 %v2726_v2, %v3142_v27 }
 0x57d   : > { %2534 = vmatpush3.bf16.msra.mxu1 %v1072_v62  ;;  %2535 = vmatprep.mubr.msk.bf16.mxu1 %vm2806_vm4, %v2805_v26 }
 0x57e   : > { %2545 = vmatprep.subr.bf16.mxu1 %v2805_v26  ;;  %v1179_v8 = vpack.c.bf16 %v1178_v5, %v1178_v5  ;;  %v2689_v5 = vld [vmem:[%s2963_s2] sm:$0xff]  }
 0x57f   : > { %2612 = vmatpush3.bf16.msra.mxu0 %v2689_v5 }
 0x580   : > { %2613 = vmatprep.subr.bf16.mxu0 %v2805_v26 }
 0x583   : > { %2614 = vmatpush3.bf16.msra.mxu0 %v2690_v6 }
 0x584   : > { %2536 = vmatmul.mubr.msk.bf16.vlgmr.msra.gmra.mrb[12].mxu1 %vm894_vm6, %v1065_v0  ;;  %2627 = vmatprep.subr.bf16.mxu0 %v2805_v26 }
 0x585   : > { %2546 = vmatpush3.bf16.msra.mxu1 %v1186_v3  ;;  %2547 = vmatprep.mubr.msk.bf16.mxu1 %vm2806_vm4, %v2805_v26 }
 0x586   : > { %1752 = vrot.lane.b32.xlu1 %v3069_v1, %s2814_s21  ;;  %2557 = vmatprep.subr.bf16.mxu1 %v2805_v26  ;;  %s2299_s21 = scalar_lea.vmem (!%p2438_p8), [#allocation2], %s2439_s23 }
 0x589   : > { %v1292_v7 = vpop.xlane.xlu1 %1291 }
 0x58a   : > { %2727 = vrcp.f32 %v1292_v7 }
 0x58c   : > { %2548 = vmatmul.mubr.msk.bf16.vlgmr.msra.gmra.mrb[16].mxu1 %vm894_vm6, %v1179_v8 }
 0x58d   : > { %2558 = vmatpush3.bf16.msra.mxu1 %v1302_v9  ;;  %2559 = vmatprep.mubr.msk.bf16.mxu1 %vm2806_vm4, %v2805_v26 }
 0x58e   : > { %2569 = vmatprep.subr.bf16.mxu1 %v2805_v26 }
 0x594   : > { %v2728_v10 = vpop.eup %2727 }
 0x595   : > { %v1294_v13 = vmul.f32 %v2728_v10, %v3146_v31 }
 0x597   : > { %v1295_v1 = vpack.c.bf16 %v1294_v13, %v1294_v13 }
 0x599   : > { %2560 = vmatmul.mubr.msk.bf16.vlgmr.msra.gmra.mrb[20].mxu1 %vm894_vm6, %v1295_v1 }
 0x59a   : > { %2570 = vmatpush3.bf16.msra.mxu1 %v1417_v14  ;;  %2571 = vmatprep.mubr.msk.bf16.mxu1 %vm2806_vm4, %v2805_v26 }
 0x59b   : > { %2581 = vmatprep.subr.bf16.mxu1 %v2805_v26 }
 0x5c5   : > { %v1407_v15 = vpop.xlane.xlu1 %1406 }
 0x5c6   : > { %2729 = vrcp.f32 %v1407_v15 }
 0x5cd   : > { %v1518_v16 = vpop.xlane.xlu1 %1517 }
 0x5ce   : > { %2731 = vrcp.f32 %v1518_v16 }
 0x5d0   : > { %v2730_v17 = vpop.eup %2729 }
 0x5d1   : > { %v1409_v18 = vmul.f32 %v2730_v17, %v3152_v39  ;;  %v1523_v19 = vpop.permute.xlu1 %1522 }
 0x5d2   : > { %v1528_v21 = vsel %vm898_vm5, %v1523_v19, 0  ;;  %v2419_v19 = vld [vmem:[%s3382_s26] ss:$0 sm:$0xff] }
 0x5d3   : > { %v1410_v20 = vpack.c.bf16 %v1409_v18, %v1409_v18 }
 0x5d5   : > { %2572 = vmatmul.mubr.msk.bf16.vlgmr.msra.gmra.mrb[24].mxu1 %vm894_vm6, %v1410_v20  ;;  %v1633_v22 = vpop.xlane.xlu0 %1632 }
 0x5d6   : > { %2582 = vmatpush3.bf16.msra.mxu1 %v1528_v21  ;;  %2733 = vrcp.f32 %v1633_v22  ;;  %2583 = vmatprep.mubr.msk.bf16.mxu1 %vm2806_vm4, %v2805_v26 }
 0x5d7   : > { %2593 = vmatprep.subr.bf16.mxu1 %v2805_v26 }
 0x5d8   : > { %v2732_v23 = vpop.eup %2731 }
 0x5d9   : > { %v1520_v25 = vmul.f32 %v2732_v23, %v3156_v43  ;;  %v1638_v27 = vpop.permute.xlu0 %1637 }
 0x5da   : > { %v1643_v29 = vsel %vm898_vm5, %v1638_v27, 0 }
 0x5db   : > { %v1521_v28 = vpack.c.bf16 %v1520_v25, %v1520_v25 }
 0x5dd   : > { %2584 = vmatmul.mubr.msk.bf16.vlgmr.msra.gmra.mrb[28].mxu1 %vm894_vm6, %v1521_v28 }
 0x5de   : > { %2594 = vmatpush3.bf16.msra.mxu1 %v1643_v29  ;;  %2595 = vmatprep.mubr.msk.bf16.mxu1 %vm2806_vm4, %v2805_v26 }
 0x5df   : > { %2605 = vmatprep.subr.bf16.mxu1 %v2805_v26 }
 0x5e0   : > { %v2734_v24 = vpop.eup %2733 }
 0x5e1   : > { %v1635_v30 = vmul.f32 %v2734_v24, %v3160_v45 }
 0x5e3   : > { %v1636_v31 = vpack.c.bf16 %v1635_v30, %v1635_v30 }
 0x5e5   : > { %2596 = vmatmul.mubr.msk.bf16.vlgmr.msra.gmra.mrb[32].mxu1 %vm894_vm6, %v1636_v31 }
 0x5e6   : > { %2607 = vmatprep.mubr.msk.bf16.mxu1 %vm2806_vm4, %v2805_v26 }
 0x602   : > { %v1748_v32 = vpop.xlane.xlu1 %1747 }
 0x603   : > { %2735 = vrcp.f32 %v1748_v32 }
 0x606   : > { %v1753_v33 = vpop.permute.xlu1 %1752 }
 0x607   : > { %v1758_v34 = vsel %vm898_vm5, %v1753_v33, 0 }
 0x608   : > { %2606 = vmatpush3.bf16.msra.mxu1 %v1758_v34 }
 0x609   : > { %2619 = vmatprep.subr.bf16.mxu1 %v2805_v26 }
 0x60d   : > { %v2736_v35 = vpop.eup %2735 }
 0x60e   : > { %v1750_v36 = vmul.f32 %v2736_v35, %v3169_v55 }
 0x610   : > { %v1751_v37 = vpack.c.bf16 %v1750_v36, %v1750_v36 }
 0x612   : > { %2608 = vmatmul.mubr.msk.bf16.vlgmr.msra.gmra.mrb[36].mxu1 %vm894_vm6, %v1751_v37 }
 0x613   : > { %2623 = vmatprep.mubr.msk.bf16.mxu1 %vm2806_vm4, %v2805_v26 }
 0x64f   : > { %v997_v38 = vpop.f32.mrb[8].mxu1 }
 0x650   : > { %1003 = vst.msk [vmem:[#allocation3] sm:$0xff] %vm894_vm6, %v997_v38  ;;  %v2525_v39 = vpop.f32.mrb[9].mxu1 }
 0x651   : > { %v1000_v40 = vpop.f32.mrb[10].mxu1  ;;  %v2691_v39 = vld [vmem:[%s2980_s5] sm:$0xff]  }
 0x652   : > { %v2526_v41 = vpop.f32.mrb[11].mxu1  ;;  %2620 = vmatpush3.bf16.msra.mxu1 %v2691_v39  ;;  %v2692_v40 = vld [vmem:[%s2980_s5 + $0x8] sm:$0xff]  }
 0x653   : > { %2621 = vmatprep.subr.bf16.mxu1 %v2805_v26 }
 0x656   : > { %2622 = vmatpush3.bf16.msra.mxu1 %v2692_v40 }
 0x657   : > { %v1108_v42 = vpop.f32.mrb[12].mxu1 }
 0x658   : > { %1115 = vrot.lane.b32.xlu0 %v1108_v42, %s2815_s24  ;;  %v2537_v52 = vpop.f32.mrb[13].mxu1 }
 0x659   : > { %v1111_v43 = vpop.f32.mrb[14].mxu1 }
 0x65a   : > { %v2538_v44 = vpop.f32.mrb[15].mxu1 }
 0x65f   : > { %v1222_v45 = vpop.f32.mrb[16].mxu1 }
 0x660   : > { %1229 = vrot.lane.b32.xlu0 %v1222_v45, %s2816_s25  ;;  %v2549_v46 = vpop.f32.mrb[17].mxu1 }
 0x661   : > { %v1225_v47 = vpop.f32.mrb[18].mxu1 }
 0x662   : > { %v2550_v48 = vpop.f32.mrb[19].mxu1 }
 0x663   : > { %v2423_v48 = vld [vmem:[%s692_s16] ss:$0 sm:$0xff]  ;;  %s3386_s16 = sld [smem:[#allocation19_spill]] (!%p2438_p8) }
 0x66c   : > { %v1338_v49 = vpop.f32.mrb[20].mxu1 }
 0x66d   : > { %1345 = vrot.lane.b32.xlu0 %v1338_v49, %s2817_s18  ;;  %v2561_v50 = vpop.f32.mrb[21].mxu1 }
 0x66e   : > { %v1341_v51 = vpop.f32.mrb[22].mxu1 }
 0x66f   : > { %v2562_v53 = vpop.f32.mrb[23].mxu1 }
 0x670   : > { %v2424_v53 = vld [vmem:[%s695_s1] ss:$0 sm:$0xff] }
 0x6a8   : > { %v1453_v54 = vpop.f32.mrb[24].mxu1 }
 0x6a9   : > { %1459 = vst.msk [vmem:[#allocation3 + $0x8] sm:$0xff] %vm894_vm6, %v1453_v54  ;;  %v2573_v55 = vpop.f32.mrb[25].mxu1 }
 0x6aa   : > { %v1456_v56 = vpop.f32.mrb[26].mxu1 }
 0x6ab   : > { %v2574_v57 = vpop.f32.mrb[27].mxu1 }
 0x6b0   : > { %v1564_v58 = vpop.f32.mrb[28].mxu1 }
 0x6b1   : > { %1571 = vrot.lane.b32.xlu1 %v1564_v58, %s2815_s24  ;;  %v2585_v59 = vpop.f32.mrb[29].mxu1  ;;  %v2693_v58 = vld [vmem:[%s2990_s27] sm:$0xff]  }
 0x6b2   : > { %v1567_v60 = vpop.f32.mrb[30].mxu1  ;;  %v2694_v59 = vld [vmem:[%s2990_s27 + $0x8] sm:$0xff]  }
 0x6b3   : > { %v2586_v61 = vpop.f32.mrb[31].mxu1  ;;  %v2695_v60 = vld [vmem:[%s2990_s27 + $0x10] sm:$0xff]  }
 0x6b4   : > { %v2696_v61 = vld [vmem:[%s2990_s27 + $0x18] sm:$0xff]  }
 0x6b8   : > { %v1679_v62 = vpop.f32.mrb[32].mxu1 }
 0x6b9   : > { %1686 = vrot.lane.b32.xlu1 %v1679_v62, %s2816_s25  ;;  %v2597_v63 = vpop.f32.mrb[33].mxu1  ;;  %v2697_v62 = vld [vmem:[%s2990_s27 + $0x20] sm:$0xff]  }
 0x6ba   : > { %v1682_v0 = vpop.f32.mrb[34].mxu1  ;;  %v2698_v63 = vld [vmem:[%s2990_s27 + $0x28] sm:$0xff]  }
 0x6bb   : > { %v2598_v2 = vpop.f32.mrb[35].mxu1  ;;  %v2699_v0 = vld [vmem:[%s2990_s27 + $0x30] sm:$0xff]  }
 0x6bc   : > { %v2700_v2 = vld [vmem:[%s2990_s27 + $0x38] sm:$0xff]  }
 0x6ca   : > { %v1116_v3 = vpop.permute.xlu0 %1115 }
 0x6cb   : > { %1119 = vst.msk [vmem:[#allocation3] sm:$0xff] %vm1118_vm7, %v1116_v3  ;;  %v2425_v3 = vld [vmem:[%s703_s15] ss:$0 sm:$0xff] }
 0x6d2   : > { %v1230_v4 = vpop.permute.xlu0 %1229 }
 0x6d3   : > { %1233 = vst.msk [vmem:[#allocation3] sm:$0xff] %vm1232_vm8, %v1230_v4 }
 0x6df   : > { %v1346_v7 = vpop.permute.xlu0 %1345 }
 0x6e0   : > { %1349 = vst.msk [vmem:[#allocation3] sm:$0xff] %vm1348_vm9, %v1346_v7 }
 0x6e5   : > { %v1794_v8 = vpop.f32.mrb[36].mxu1 }
 0x6e6   : > { %1801 = vrot.lane.b32.xlu1 %v1794_v8, %s2817_s18  ;;  %v2609_v9 = vpop.f32.mrb[37].mxu1  ;;  %s3384_s18 = sld [smem:[#allocation20_spill]] (!%p2438_p8) }
 0x6e7   : > { %v1797_v10 = vpop.f32.mrb[38].mxu1  ;;  %v1805_v16 = vld [vmem:[#allocation3] sm:$0xff] }
 0x6e8   : > { %v2610_v13 = vpop.f32.mrb[39].mxu1 }
 0x723   : > { %v1572_v1 = vpop.permute.xlu1 %1571 }
 0x724   : > { %1574 = vst.msk [vmem:[#allocation3 + $0x8] sm:$0xff] %vm1118_vm7, %v1572_v1 }
 0x72b   : > { %v1687_v14 = vpop.permute.xlu1 %1686 }
 0x72c   : > { %1689 = vst.msk [vmem:[#allocation3 + $0x8] sm:$0xff] %vm1232_vm8, %v1687_v14 }
 0x758   : > { %v1802_v15 = vpop.permute.xlu1 %1801 }
 0x759   : > { %1804 = vst.msk [vmem:[#allocation3 + $0x8] sm:$0xff] %vm1348_vm9, %v1802_v15 }
 0x760   : > { %v1806_v17 = vld [vmem:[#allocation3 + $0x8] sm:$0xff] }
 0x761   : > { %v1807_v18 = vpack.c.bf16 %v1806_v17, %v1805_v16 }
 0x763   : > { %2616 = vmatmul.mubr.msk.bf16.vlgmr.msra.gmra.mrb[28].mxu0 %vm739_vm3, %v1807_v18 }
 0x764   : > { %2643 = vmatprep.mubr.msk.bf16.mxu0 %vm2806_vm4, %v2805_v26  ;;  %2628 = vmatpush3.bf16.msra.mxu0 %v2693_v58 }
 0x765   : > { %2629 = vmatprep.subr.bf16.mxu0 %v2805_v26 }
 0x768   : > { %2630 = vmatpush3.bf16.msra.mxu0 %v2694_v59 }
 0x769   : > { %2631 = vmatprep.subr.bf16.mxu0 %v2805_v26 }
 0x76c   : > { %2632 = vmatpush3.bf16.msra.mxu0 %v2695_v60 }
 0x76d   : > { %2633 = vmatprep.subr.bf16.mxu0 %v2805_v26 }
 0x770   : > { %2634 = vmatpush3.bf16.msra.mxu0 %v2696_v61 }
 0x771   : > { %2635 = vmatprep.subr.bf16.mxu0 %v2805_v26 }
 0x774   : > { %2636 = vmatpush3.bf16.msra.mxu0 %v2697_v62 }
 0x775   : > { %2637 = vmatprep.subr.bf16.mxu0 %v2805_v26 }
 0x778   : > { %2638 = vmatpush3.bf16.msra.mxu0 %v2698_v63 }
 0x779   : > { %2639 = vmatprep.subr.bf16.mxu0 %v2805_v26 }
 0x77c   : > { %2640 = vmatpush3.bf16.msra.mxu0 %v2699_v0 }
 0x77d   : > { %2641 = vmatprep.subr.bf16.mxu0 %v2805_v26 }
 0x780   : > { %2642 = vmatpush3.bf16.msra.mxu0 %v2700_v2 }
 0x836   : > { %v1868_v20 = vpop.f32.mrb[28].mxu0 }
 0x837   : > { %v1869_v21 = vadd.f32 %v2419_v19, %v1868_v20  ;;  %v2617_v22 = vpop.f32.mrb[29].mxu0 }
 0x838   : > { %v1871_v23 = vpop.f32.mrb[30].mxu0 }
 0x839   : > { %v3241_v25 = vadd.f32 %v1869_v21, %v3009_v11  ;;  %v1872_v27 = vadd.f32 %v2419_v19, %v1871_v23  ;;  %v2618_v28 = vpop.f32.mrb[31].mxu0  ;;  %v2429_v23 = vld [vmem:[%s711_s0] ss:$0 sm:$0xff]  ;;  %s2125_s0 = scalar_lea.vmem (!%p2438_p8), [#allocation2], %s2124_s30 }
 0x83b   : > { %v3244_v29 = vadd.f32 %v1872_v27, %v3011_v12  ;;  %v1879_v24 = vsel %vm739_vm3, %v3241_v25, 0.0 }
 0x83c   : > { %1880 = vadd.xlane.f32.xlu0 %v1879_v24 }
 0x83d   : > { %v1882_v30 = vsel %vm739_vm3, %v3244_v29, 0.0 }
 0x83e   : > { %1883 = vadd.xlane.f32.xlu1 %v1882_v30 }
 0x8c9   : > { %v1881_v31 = vpop.xlane.xlu0 %1880 }
 0x8ca   : > { %v1885_v32 = vmul.f32 0.03125, %v1881_v31 }
 0x8cb   : > { %v1884_v33 = vpop.xlane.xlu1 %1883 }
 0x8cc   : > { %v1887_v11 = vsub.f32 %v3241_v25, %v1885_v32  ;;  %v1886_v34 = vmul.f32 0.03125, %v1884_v33 }
 0x8ce   : > { %v1888_v35 = vsub.f32 %v3244_v29, %v1886_v34  ;;  %v1889_v12 = vmul.f32 %v1887_v11, %v1887_v11 }
 0x8d0   : > { %v1891_v36 = vsel %vm739_vm3, %v1889_v12, 0.0  ;;  %v1890_v37 = vmul.f32 %v1888_v35, %v1888_v35 }
 0x8d1   : > { %1892 = vadd.xlane.f32.xlu0 %v1891_v36 }
 0x8d2   : > { %v1894_v38 = vsel %vm739_vm3, %v1890_v37, 0.0 }
 0x8d5   : > { %1895 = vadd.xlane.f32.xlu0 %v1894_v38 }
 0x95e   : > { %v1893_v41 = vpop.xlane.xlu0 %1892 }
 0x95f   : > { %v1897_v42 = vmul.f32 0.03125, %v1893_v41  ;;  %v2749_v41 = vld [vmem:[%s3384_s18] sm:$0xff] (!%p2438_p8)  }
 0x961   : > { %v1899_v52 = vadd.f32 1e-05, %v1897_v42  ;;  %v2818_v42 = vmov (!%p2438_p8), 0.0  }
 0x962   : > { %v1896_v43 = vpop.xlane.xlu0 %1895  ;;  %2647 = vmatprep.subr.bf16.mxu0 (!%p2438_p8), %v2818_v42 }
 0x963   : > { %2737 = vrsqrt.f32 %v1899_v52  ;;  %v1898_v44 = vmul.f32 0.03125, %v1896_v43  ;;  %v2750_v52 = vld [vmem:[%s3384_s18 + $0x8] sm:$0xff] (!%p2438_p8)  }
 0x965   : > { %v1900_v45 = vadd.f32 1e-05, %v1898_v44 }
 0x967   : > { %2739 = vrsqrt.f32 %v1900_v45 }
 0x96d   : > { %v2738_v46 = vpop.eup %2737 }
 0x96e   : > { %v1903_v47 = vmul.f32 %v2738_v46, %v1887_v11 }
 0x970   : > { %v1911_v50 = vmul.f32 %v2423_v48, %v1903_v47  ;;  %v2441_v47 = vld [vmem:[%s3385_s29] ss:$0 sm:$0xff] (!%p2438_p8) }
 0x971   : > { %v2740_v49 = vpop.eup %2739 }
 0x972   : > { %v1904_v51 = vmul.f32 %v2740_v49, %v1888_v35  ;;  %v1919_v55 = vadd.f32 %v2424_v53, %v1911_v50  ;;  %v2442_v49 = vld [vmem:[%s3386_s16] ss:$0 sm:$0xff] (!%p2438_p8) }
 0x974   : > { %v1912_v54 = vmul.f32 %v2423_v48, %v1904_v51 }
 0x976   : > { %v1920_v56 = vadd.f32 %v2424_v53, %v1912_v54 }
 0x978   : > { %v1921_v57 = vpack.c.bf16 %v1920_v56, %v1919_v55 }
 0x97a   : > { %2624 = vmatmul.mubr.msk.bf16.vlgmr.msra.gmra.mrb[40].mxu1 %vm739_vm3, %v1921_v57 }
 0xa4d   : > { %v1982_v4 = vpop.f32.mrb[40].mxu1 }
 0xa4e   : > { %v1983_v5 = vadd.f32 %v2425_v3, %v1982_v4  ;;  %v2625_v6 = vpop.f32.mrb[41].mxu1 }
 0xa4f   : > { %v1985_v7 = vpop.f32.mrb[42].mxu1 }
 0xa50   : > { %v1989_v8 = vmul.f32 -1.702, %v1983_v5  ;;  %v1986_v9 = vadd.f32 %v2425_v3, %v1985_v7  ;;  %v2626_v10 = vpop.f32.mrb[43].mxu1 }
 0xa52   : > { %v1991_v13 = vmul.f32 1.442695, %v1989_v8  ;;  %v1990_v1 = vmul.f32 -1.702, %v1986_v9 }
 0xa54   : > { %2741 = vpow2.f32 %v1991_v13  ;;  %v1993_v14 = vmul.f32 1.442695, %v1990_v1 }
 0xa56   : > { %2743 = vpow2.f32 %v1993_v14 }
 0xa5e   : > { %v2742_v26 = vpop.eup %2741 }
 0xa5f   : > { %v1995_v15 = vadd.f32 1.0, %v2742_v26 }
 0xa60   : > { %v2744_v16 = vpop.eup %2743 }
 0xa61   : > { %2745 = vrcp.f32 %v1995_v15  ;;  %v1996_v17 = vadd.f32 1.0, %v2744_v16 }
 0xa63   : > { %2747 = vrcp.f32 %v1996_v17 }
 0xa6b   : > { %v2746_v18 = vpop.eup %2745 }
 0xa6c   : > { %v2001_v20 = vmul.f32 %v2746_v18, %v1983_v5 }
 0xa6d   : > { %v2748_v19 = vpop.eup %2747 }
 0xa6e   : > { %v2002_v21 = vmul.f32 %v2748_v19, %v1986_v9 }
 0xa70   : > { %v2003_v22 = vpack.c.bf16 %v2002_v21, %v2001_v20 }
 0xa72   : > { %2644 = vmatmul.mubr.bf16.vlgmr.msra.gmra.mrb[32].mxu0 %v2003_v22 }
 0xa73   : > { %2651 = vmatprep.mubr.msk.bf16.mxu0 (!%p2438_p8), %vm2819_vm12, %v2818_v42  ;;  %2648 = vmatpush3.bf16.msra.mxu0 (!%p2438_p8), %v2749_v41 }
 0xa74   : > { %2649 = vmatprep.subr.bf16.mxu0 (!%p2438_p8), %v2818_v42 }
 0xa77   : > { %2650 = vmatpush3.bf16.msra.mxu0 (!%p2438_p8), %v2750_v52 }
 0xb45   : > { %v2109_v27 = vpop.f32.mrb[32].mxu0 }
 0xb46   : > { %v2110_v28 = vadd.f32 %v2429_v23, %v2109_v27  ;;  %v2645_v24 = vpop.f32.mrb[33].mxu0  ;;  %2123 = sbr.rel (%p2438_p8) target bundleno = 3433 (0xd69), region = 96 }
 0xb47   : > { %v2112_v30 = vpop.f32.mrb[34].mxu0 }
 0xb48   : > { %v2116_v31 = vadd.f32 %v2110_v28, %v3241_v25  ;;  %v2113_v32 = vadd.f32 %v2429_v23, %v2112_v30  ;;  %v2646_v33 = vpop.f32.mrb[35].mxu0 }
 0xb4a   : > { %2118 = vst.msk [vmem:[#allocation2] sm:$0xff] %vm739_vm3, %v2116_v31  ;;  %v2117_v11 = vadd.f32 %v2113_v32, %v3244_v29 }
 0xb4c   : > { %2119 = vst.msk [vmem:[#allocation2 + $0x8] sm:$0xff] %vm739_vm3, %v2117_v11 }
 0xb53   : > { %v2126_v34 = vld [vmem:[%s2125_s0] sm:$0x1]  ;;  %v2440_v35 = vld [vmem:[%s2299_s21 + $0x8] sm:$0x1] }
 0xb54   : > { %v2132_v12 = vrot.slane %v2440_v35, 7 }
 0xb56   : > { %v2135_v25 = vsel %vm2134_vm10, %v2126_v34, %v2132_v12 }
 0xb57   : > { %v2139_v36 = vsel %vm2138_vm11, %v2135_v25, 0.0 }
 0xb58   : > { %2140 = vadd.xlane.f32.xlu0 %v2139_v36 }
 0xbe5   : > { %v2141_v37 = vpop.xlane.xlu0 %2140 }
 0xbe6   : > { %v2142_v38 = vmul.f32 0.03125, %v2141_v37 }
 0xbe8   : > { %v2143_v29 = vsub.f32 %v2135_v25, %v2142_v38 }
 0xbea   : > { %v2144_v39 = vmul.f32 %v2143_v29, %v2143_v29 }
 0xbec   : > { %v2145_v40 = vsel %vm2138_vm11, %v2144_v39, 0.0 }
 0xbed   : > { %2146 = vadd.xlane.f32.xlu0 %v2145_v40 }
 0xc7a   : > { %v2147_v43 = vpop.xlane.xlu0 %2146 }
 0xc7b   : > { %v2148_v44 = vmul.f32 0.03125, %v2147_v43 }
 0xc7d   : > { %v2149_v45 = vadd.f32 1e-05, %v2148_v44 }
 0xc7f   : > { %2751 = vrsqrt.f32 %v2149_v45 }
 0xc89   : > { %v2752_v46 = vpop.eup %2751 }
 0xc8a   : > { %v2151_v48 = vmul.f32 %v2752_v46, %v2143_v29 }
 0xc8c   : > { %v2158_v50 = vmul.f32 %v2441_v47, %v2151_v48 }
 0xc8e   : > { %v2165_v51 = vadd.f32 %v2442_v49, %v2158_v50 }
 0xc90   : > { %v2166_v53 = vpack.c.bf16 %v2165_v51, %v2165_v51 }
 0xc92   : > { %2652 = vmatmul.mubr.msk.bf16.vlgmr.msra.gmra.mrb[0].mxu0 %vm739_vm3, %v2166_v53 }
 0xd65   : > { %v2220_v54 = vpop.f32.mrb[0].mxu0 }
 0xd66   : > { %2226 = vst [vmem:[#allocation7] sm:$0x3] %v2220_v54  ;;  %v2653_v55 = vpop.f32.mrb[1].mxu0 }
 0xd67   : > { %v2223_v56 = vpop.f32.mrb[2].mxu0 }
 0xd68   : > { %v2654_v57 = vpop.f32.mrb[3].mxu0 }
 0xd69 PF: > { %p2659_p9 = scmp.eq.s32.totalorder %s2934_s12, 1  ;;  %s2820_s1 = smov [#allocation7]  }
 0xd6a   : > { %s2234_s19 = sshll.u32 %s2820_s1, 4  ;;  %s2235_s19 = int_to_ptr.vmem [resolvable:$true] %s2234_s19 }
 0xd6b   : > { %s2763_s15 = scalar_lea.vmem %s2235_s19, 32  ;;  %p2770_p13 = scmp.lt.s32.totalorder %s2235_s19, %s2235_s19 }
 0xd6c   : > { %p2764_p10 = scmp.ne.s32.totalorder %s2235_s19, %s2763_s15  ;;  %p2771_p0 = scmp.lt.s32.totalorder %s2763_s15, %s2763_s15 }
 0xd6e   : > { %p2765_p11 = pnand %p2764_p10, %p2659_p9  ;;  %p2772_p1 = por %p2771_p0, %p2770_p13 }
 0xd70   : > { %p2766_p12 = pneg %p2765_p11 }
 0xd72   : > { %p2773_p2 = pnand %p2772_p1, %p2766_p12 }
 0xd74   : > { %2776 = shalt.err (!%p2773_p2)
}
 0xd75   : > { %s3387_s23 = sld [smem:[#allocation21_spill]] }
 0xd7b   : > { %s2777_s0 = scalar_lea.hbm %s3387_s23, 32 }
 0xd7c   : > { %p2778_p3 = scmp.ne.s32.totalorder %s3387_s23, %s2777_s0  ;;  %p2783_p6 = scmp.lt.u32.totalorder %s2777_s0, %s3387_s23 }
 0xd7e   : > { %p2779_p4 = pnand %p2778_p3, %p2659_p9 }
 0xd80   : > { %p2780_p5 = pneg %p2779_p4 }
 0xd82   : > { %p2785_p7 = pnand %p2783_p6, %p2780_p5 }
 0xd84   : > { %2788 = shalt.err (!%p2785_p7)
}
 0xd85   : > { %2656 = dma.vmem_to_hbm [thread:$0]  (%p2659_p9), %s2235_s19, 32, %s3387_s23, [#allocation8]  }
 0xd86   : > { %2796 = dma.done.wait (%p2659_p9), [#allocation8], 32  }
 0xd87   : > { %2798 = vsyncadd (%p2659_p9), [#allocation8], 4294967264 }
 0xd88 PF: > { %s3388_s22 = sld [smem:[#allocation11_spill]] }
 0xd8e   : > { %s33_s2 = sadd.s32 1, %s3388_s22  }
 0xd8f   : > { %p30_p8 = scmp.ge.s32.totalorder %s33_s2, 4  }
 0xd91   :  { %32 = sbr.rel (!%p30_p8) target bundleno = 21 (0x15), region = 158 }
 0xd98   :  { %2247 = vsyncpa [#allocation8], 1 }
 0xd99   :  { %2249 = vsyncpa [#allocation8 + $0x1], 1 }

</bundles_post_ra>
